<compile_context>
chip_gen: v5e
topology: v5e:2x2
jax: 0.10.0
libtpu: 0.0.40
codegen_flags: <defaults>
</compile_context>

<pallas_src>
import functools

import jax
import jax.numpy as jnp
from jax import lax
from jax.experimental import pallas as pl
from jax.experimental.pallas import tpu as pltpu


def _sparse_conv_kernel(slab_ref, w_ref, b_ref, y_ref, m_ref, *,
                        K, W, TH, Cc, Cm, Cout_p):
    """One (batch, row-tile) grid step.

    slab_ref: (Ctot, Lin) bf16  lane-flat tile: rows [0,Cc) = conv channels + mask-sum
                                (zero-padded), rows [Cc,Cc+Cm) = mask channels
                                (-inf padded); Lin = (TH+2p)*W + 2p
    w_ref:    (K*K, Cout_p+1, Cc) bf16  per-tap weights; row Cout_p is the all-ones
                                        box filter reading only the mask-sum channel
    b_ref:    (Cout_p, 1) f32   bias (zero in the padded rows)
    y_ref:    (Cout_p, TH*W) f32  relu(conv * normalizer + bias), lane-dense
    m_ref:    (Cm, TH*W) f32    KxK / stride-1 max-pool of the mask, channel-major
    """
    p = K // 2
    TM = TH * W
    Co_tot = Cout_p + 1

    # Lane-validity depends only on the output column index; hoist the iota.
    wcol = lax.broadcasted_iota(jnp.int32, (1, TM), 1) % W

    acc = jnp.zeros((Co_tot, TM), jnp.float32)
    mmax = jnp.full((Cm, TM), -jnp.inf, jnp.float32)
    for kh in range(K):
        for kw in range(K):
            off = kh * W + kw                               # constant lane offset
            ok = (wcol >= p - kw) & (wcol < W + p - kw)     # inside-image columns
            # Conv channels (+ mask-sum): zero the out-of-image columns, then MXU.
            xc = jnp.where(ok, slab_ref[0:Cc, off:off + TM], 0.0
                           ).astype(jnp.bfloat16)
            acc = acc + jnp.dot(w_ref[kh * K + kw], xc,
                                preferred_element_type=jnp.float32)
            # Mask channels: -inf outside the image (MaxPool2d padding semantics).
            mt = jnp.where(ok,
                           slab_ref[Cc:Cc + Cm, off:off + TM].astype(jnp.float32),
                           -jnp.inf)
            mmax = jnp.maximum(mmax, mt)

    box = acc[Co_tot - 1:Co_tot, :]                         # sparsity-conv denominator
    inv = 1.0 / (box + 1e-8)                                # exact (see review note)
    y = acc[:Cout_p, :] * inv + b_ref[...]
    y_ref[...] = jnp.maximum(y, 0.0)
    m_ref[...] = mmax


def _round_up(x, m):
    return ((x + m - 1) // m) * m


def _vmem_budget_bytes():
    try:
        cap = int(pltpu.get_tpu_info().vmem_capacity_bytes)
    except Exception:
        cap = 64 * 1024 * 1024          # conservative (v7x per-TC VMEM)
    return int(min(cap * 3 // 4, 96 * 1024 * 1024))


def _pick_row_tile(H, W, B, p, Ctot, Cout_p, Cm, budget):
    """Largest row tile TH (divisor of H) whose double-buffered blocks fit `budget`,
    preferring lane-dense TH*W (multiple of 128), >=2 grid steps, and TM ~512-2048."""
    def footprint(th):
        tm = th * W
        lin = (th + 2 * p) * W + 2 * p
        return 2 * (Ctot * lin * 2 + (Cout_p + Cm) * tm * 4)

    # nTH > 1 only when TH*W is a 128-multiple (valid BlockSpecs + unmasked stores).
    cands = [d for d in range(1, H + 1)
             if H % d == 0 and (d == H or (d * W) % 128 == 0)]
    feas = [d for d in cands if footprint(d) <= budget]
    if not feas:
        feas = [min(cands, key=footprint)]

    def score(th):
        tm = th * W
        return (B * (H // th) >= 2,       # keep both v7x TensorCores busy
                tm % 128 == 0,            # unmasked lane-dense stores
                512 <= tm <= 2048,        # amortize ~0.35us/step overhead
                -abs(tm - 1024))
    return max(feas, key=score)


def sparse_conv(x_nchw, mask_nchw, weight_oihw, bias):
    """Pallas implementation of SparseConv.forward.  Inputs/outputs are NCHW."""
    B, Cin, H, W = x_nchw.shape
    Cout, _, K, _ = weight_oihw.shape
    Cm = mask_nchw.shape[1]
    p = K // 2
    Cc = Cin + 1                      # conv channels + mask-sum channel
    Ctot = Cc + Cm                    # + raw mask channels for the pool
    Cout_p = _round_up(Cout, 8)       # sublane-aligned output rows
    Co_tot = Cout_p + 1               # + box-filter row

    budget = _vmem_budget_bytes()
    TH = _pick_row_tile(H, W, B, p, Ctot, Cout_p, Cm, budget)
    nTH = H // TH
    THh = TH + 2 * p
    TM = TH * W
    Lin = THh * W + 2 * p

    # ---------------- wrapper-side layout (single bf16 slab, ~(1+2p/TH)x bytes) ----
    xf = x_nchw.astype(jnp.bfloat16)
    mf = mask_nchw.astype(jnp.bfloat16)
    msum = jnp.sum(mask_nchw, axis=1, keepdims=True).astype(jnp.bfloat16)
    convp = jnp.pad(jnp.concatenate([xf, msum], axis=1),
                    ((0, 0), (0, 0), (p, p), (0, 0)))                  # zero rows
    maskp = jnp.pad(mf, ((0, 0), (0, 0), (p, p), (0, 0)),
                    constant_values=-jnp.inf)                          # -inf rows
    slab = jnp.concatenate([convp, maskp], axis=1)                     # (B,Ctot,H+2p,W)

    if nTH == 1:
        wins = slab.reshape(B, 1, Ctot, THh * W)
    else:  # overlapping vertical-halo row windows (2p duplicated rows per tile)
        wins = jnp.stack([slab[:, :, t * TH:t * TH + THh, :]
                          for t in range(nTH)],
                         axis=1).reshape(B, nTH, Ctot, THh * W)
    # p extra lanes front/back (always lane-masked in-kernel; value irrelevant).
    slab_in = jnp.pad(wins, ((0, 0), (0, 0), (0, 0), (p, p))
                      ).reshape(B * nTH, Ctot, Lin)

    # Per-tap weights (K*K, Co_tot, Cc): conv rows + all-ones box row on the
    # mask-sum channel (the sparsity conv denominator falls out of the same matmul).
    wr = jnp.transpose(weight_oihw, (2, 3, 0, 1)).reshape(K * K, Cout, Cin)
    w_taps = jnp.zeros((K * K, Co_tot, Cc), jnp.float32)
    w_taps = w_taps.at[:, :Cout, :Cin].set(wr)
    w_taps = w_taps.at[:, Co_tot - 1, Cin].set(1.0)
    w_in = w_taps.astype(jnp.bfloat16)
    b_in = jnp.zeros((Cout_p, 1), jnp.float32).at[:Cout, 0].set(
        bias.astype(jnp.float32))

    kernel = functools.partial(_sparse_conv_kernel,
                               K=K, W=W, TH=TH, Cc=Cc, Cm=Cm, Cout_p=Cout_p)

    flops = 2 * B * H * W * K * K * Cc * Co_tot
    bytes_accessed = (slab_in.size * 2 + w_in.size * 2 + b_in.size * 4
                      + B * Cout_p * H * W * 4 + B * Cm * H * W * 4)

    y_pk, m_pk = pl.pallas_call(
        kernel,
        out_shape=(jax.ShapeDtypeStruct((B, Cout_p, H * W), jnp.float32),
                   jax.ShapeDtypeStruct((B, Cm, H * W), jnp.float32)),
        grid_spec=pltpu.PrefetchScalarGridSpec(
            num_scalar_prefetch=0,
            grid=(B, nTH),
            in_specs=[
                pl.BlockSpec((None, Ctot, Lin), lambda b, t: (b * nTH + t, 0, 0)),
                pl.BlockSpec((K * K, Co_tot, Cc), lambda b, t: (0, 0, 0)),
                pl.BlockSpec((Cout_p, 1), lambda b, t: (0, 0)),
            ],
            out_specs=(
                pl.BlockSpec((None, Cout_p, TM), lambda b, t: (b, 0, t)),
                pl.BlockSpec((None, Cm, TM), lambda b, t: (b, 0, t)),
            ),
        ),
        compiler_params=pltpu.CompilerParams(
            dimension_semantics=("parallel", "parallel"),
            vmem_limit_bytes=budget),
        cost_estimate=pl.CostEstimate(flops=int(flops), transcendentals=0,
                                      bytes_accessed=int(bytes_accessed)),
    )(slab_in, w_in, b_in)

    # Free reshapes (outputs are already channel-major, row-major over pixels).
    y = y_pk.reshape(B, Cout_p, H, W)
    if Cout_p != Cout:
        y = y[:, :Cout]
    mout = m_pk.reshape(B, Cm, H, W)
    return y, mout


def reference(x, mask, weight, bias):
    """Pure-JAX reference matching the PyTorch module semantics (NCHW, f32)."""
    B, Cin, H, W = x.shape
    Cout, _, K, _ = weight.shape
    p = K // 2
    xp = jnp.pad(x, ((0, 0), (0, 0), (p, p), (p, p)))
    msum = jnp.sum(mask, axis=1, keepdims=True)
    msump = jnp.pad(msum, ((0, 0), (0, 0), (p, p), (p, p)))

    conv = jnp.zeros((B, Cout, H, W), jnp.float32)
    box = jnp.zeros((B, 1, H, W), jnp.float32)
    for kh in range(K):
        for kw in range(K):
            conv = conv + jnp.einsum(
                'bchw,oc->bohw', xp[:, :, kh:kh + H, kw:kw + W],
                weight[:, :, kh, kw], precision=lax.Precision.HIGHEST)
            box = box + msump[:, :, kh:kh + H, kw:kw + W]
    normalizer = 1.0 / (box + 1e-8)
    y = jnp.maximum(conv * normalizer + bias[None, :, None, None], 0.0)
    mpool = lax.reduce_window(mask, -jnp.inf, lax.max,
                              (1, 1, K, K), (1, 1, 1, 1), 'SAME')
    return y, mpool


if __name__ == "__main__":
    B, Cin, Cout, H, W, K = 2, 4, 8, 16, 16, 3
    key = jax.random.PRNGKey(0)
    k1, k2, k3 = jax.random.split(key, 3)

    x = jax.random.normal(k1, (B, Cin, H, W), jnp.float32)
    mask = (jax.random.uniform(k2, (B, Cin, H, W)) > 0.5).astype(jnp.float32)
    # Deterministic synthetic parameters (module shapes: conv weight OIHW, bias=zeros).
    weight = 0.1 * jax.random.normal(k3, (Cout, Cin, K, K), jnp.float32)
    bias = jnp.zeros((Cout,), jnp.float32)  # nn.Parameter(torch.zeros(out_channels))

    y, m = sparse_conv(x, mask, weight, bias)
    jax.block_until_ready((y, m))

    y_ref, m_ref = reference(x, mask, weight, bias)
    assert y.shape == (B, Cout, H, W) and m.shape == (B, Cin, H, W)
    assert jnp.allclose(y, y_ref, rtol=2e-2, atol=2e-2), "conv branch mismatch"
    assert jnp.allclose(m, m_ref), "max-pool branch mismatch"
    print("KERNEL_OK")
</pallas_src>

<mosaic_0001>
module attributes {stable_mosaic.version = 11 : i64} {
  func.func @_sparse_conv_kernel(%arg0: i32, %arg1: i32, %arg2: memref<1x9x290xbf16, #tpu.memory_space<vmem>>, %arg3: memref<9x9x5xbf16, #tpu.memory_space<vmem>>, %arg4: memref<8x1xf32, #tpu.memory_space<vmem>>, %arg5: memref<1x8x256xf32, #tpu.memory_space<vmem>>, %arg6: memref<1x4x256xf32, #tpu.memory_space<vmem>>) attributes {dimension_semantics = [#tpu.dimension_semantics<parallel>, #tpu.dimension_semantics<parallel>], iteration_bounds = array<i64: 2, 1>, scalar_prefetch = 0 : i64, scratch_operands = 0 : i64, tpu.core_type = #tpu.core_type<tc>, window_params = [{transform_indices = @transform_0, window_bounds = array<i64: 1, 9, 290>}, {pipeline_mode = #tpu.pipeline_mode<synchronous>, transform_indices = @transform_1, window_bounds = array<i64: 9, 9, 5>}, {pipeline_mode = #tpu.pipeline_mode<synchronous>, transform_indices = @transform_2, window_bounds = array<i64: 8, 1>}, {transform_indices = @transform_3, window_bounds = array<i64: 1, 8, 256>}, {transform_indices = @transform_4, window_bounds = array<i64: 1, 4, 256>}]} {
    %0 = tpu.iota {dimensions = array<i32: 1>} : vector<1x256xi32>
    %c16_i32 = arith.constant 16 : i32
    %c0_i32 = arith.constant 0 : i32
    %1 = arith.cmpi eq, %c16_i32, %c0_i32 : i32
    %c1_i32 = arith.constant 1 : i32
    %2 = arith.select %1, %c1_i32, %c16_i32 : i32
    %3 = vector.broadcast %2 : i32 to vector<1x256xi32>
    %4 = arith.remsi %0, %3 : vector<1x256xi32>
    %c0_i32_0 = arith.constant 0 : i32
    %5 = vector.broadcast %c0_i32_0 : i32 to vector<1x256xi32>
    %6 = arith.cmpi ne, %4, %5 : vector<1x256xi32>
    %c0_i32_1 = arith.constant 0 : i32
    %7 = vector.broadcast %c0_i32_1 : i32 to vector<1x256xi32>
    %8 = arith.cmpi slt, %4, %7 : vector<1x256xi32>
    %c0_i32_2 = arith.constant 0 : i32
    %9 = arith.cmpi slt, %2, %c0_i32_2 : i32
    %10 = vector.broadcast %9 : i1 to vector<1x256xi1>
    %11 = vector.broadcast %10 : vector<1x256xi1> to vector<1x256xi1>
    %12 = arith.xori %8, %11 : vector<1x256xi1>
    %13 = arith.andi %12, %6 : vector<1x256xi1>
    %14 = vector.broadcast %2 : i32 to vector<1x256xi32>
    %15 = arith.addi %4, %14 : vector<1x256xi32>
    %16 = arith.select %13, %15, %4 : vector<1x256xi1>, vector<1x256xi32>
    %cst = arith.constant 0.000000e+00 : f32
    %17 = vector.broadcast %cst : f32 to vector<9x256xf32>
    %cst_3 = arith.constant 0xFF800000 : f32
    %18 = vector.broadcast %cst_3 : f32 to vector<4x256xf32>
    %c1_i32_4 = arith.constant 1 : i32
    %19 = vector.broadcast %c1_i32_4 : i32 to vector<1x256xi32>
    %20 = arith.cmpi sge, %16, %19 : vector<1x256xi32>
    %c17_i32 = arith.constant 17 : i32
    %21 = vector.broadcast %c17_i32 : i32 to vector<1x256xi32>
    %22 = arith.cmpi slt, %16, %21 : vector<1x256xi32>
    %23 = arith.andi %20, %22 : vector<1x256xi1>
    %c0 = arith.constant 0 : index
    %c0_5 = arith.constant 0 : index
    %c0_6 = arith.constant 0 : index
    %24 = vector.load %arg2[%c0, %c0_5, %c0_6] : memref<1x9x290xbf16, #tpu.memory_space<vmem>>, vector<1x5x256xbf16>
    %25 = vector.shape_cast %24 : vector<1x5x256xbf16> to vector<5x256xbf16>
    %cst_7 = arith.constant 0.000000e+00 : f32
    %26 = arith.truncf %cst_7 : f32 to bf16
    %27 = vector.shape_cast %23 : vector<1x256xi1> to vector<1x256xi1>
    %28 = vector.broadcast %27 : vector<1x256xi1> to vector<5x256xi1>
    %29 = vector.broadcast %26 : bf16 to vector<5x256xbf16>
    %30 = arith.select %28, %25, %29 : vector<5x256xi1>, vector<5x256xbf16>
    %c0_8 = arith.constant 0 : index
    %c0_9 = arith.constant 0 : index
    %c0_10 = arith.constant 0 : index
    %31 = vector.load %arg3[%c0_8, %c0_9, %c0_10] : memref<9x9x5xbf16, #tpu.memory_space<vmem>>, vector<1x9x5xbf16>
    %32 = vector.shape_cast %31 : vector<1x9x5xbf16> to vector<9x5xbf16>
    %cst_11 = arith.constant dense<0.000000e+00> : vector<9x256xf32>
    %33 = tpu.matmul %32, %30, %cst_11 {dimension_numbers = #tpu.dot_dimension_numbers<[1], [0], [0], [1], [0, 0, 1, 1], [], []>} : vector<9x5xbf16>, vector<5x256xbf16>, vector<9x256xf32> -> vector<9x256xf32>
    %34 = arith.addf %17, %33 : vector<9x256xf32>
    %c0_12 = arith.constant 0 : index
    %c5 = arith.constant 5 : index
    %c0_13 = arith.constant 0 : index
    %35 = vector.load %arg2[%c0_12, %c5, %c0_13] : memref<1x9x290xbf16, #tpu.memory_space<vmem>>, vector<1x4x256xbf16>
    %36 = vector.shape_cast %35 : vector<1x4x256xbf16> to vector<4x256xbf16>
    %37 = arith.extf %36 : vector<4x256xbf16> to vector<4x256xf32>
    %cst_14 = arith.constant 0xFF800000 : f32
    %38 = vector.shape_cast %23 : vector<1x256xi1> to vector<1x256xi1>
    %39 = vector.broadcast %38 : vector<1x256xi1> to vector<4x256xi1>
    %40 = vector.broadcast %cst_14 : f32 to vector<4x256xf32>
    %41 = arith.select %39, %37, %40 : vector<4x256xi1>, vector<4x256xf32>
    %42 = arith.maximumf %18, %41 : vector<4x256xf32>
    %c0_i32_15 = arith.constant 0 : i32
    %43 = vector.broadcast %c0_i32_15 : i32 to vector<1x256xi32>
    %44 = arith.cmpi sge, %16, %43 : vector<1x256xi32>
    %c16_i32_16 = arith.constant 16 : i32
    %45 = vector.broadcast %c16_i32_16 : i32 to vector<1x256xi32>
    %46 = arith.cmpi slt, %16, %45 : vector<1x256xi32>
    %47 = arith.andi %44, %46 : vector<1x256xi1>
    %c0_17 = arith.constant 0 : index
    %c0_18 = arith.constant 0 : index
    %c1 = arith.constant 1 : index
    %48 = vector.load %arg2[%c0_17, %c0_18, %c1] : memref<1x9x290xbf16, #tpu.memory_space<vmem>>, vector<1x5x256xbf16>
    %49 = vector.shape_cast %48 : vector<1x5x256xbf16> to vector<5x256xbf16>
    %cst_19 = arith.constant 0.000000e+00 : f32
    %50 = arith.truncf %cst_19 : f32 to bf16
    %51 = vector.shape_cast %47 : vector<1x256xi1> to vector<1x256xi1>
    %52 = vector.broadcast %51 : vector<1x256xi1> to vector<5x256xi1>
    %53 = vector.broadcast %50 : bf16 to vector<5x256xbf16>
    %54 = arith.select %52, %49, %53 : vector<5x256xi1>, vector<5x256xbf16>
    %c1_20 = arith.constant 1 : index
    %c0_21 = arith.constant 0 : index
    %c0_22 = arith.constant 0 : index
    %55 = vector.load %arg3[%c1_20, %c0_21, %c0_22] : memref<9x9x5xbf16, #tpu.memory_space<vmem>>, vector<1x9x5xbf16>
    %56 = vector.shape_cast %55 : vector<1x9x5xbf16> to vector<9x5xbf16>
    %cst_23 = arith.constant dense<0.000000e+00> : vector<9x256xf32>
    %57 = tpu.matmul %56, %54, %cst_23 {dimension_numbers = #tpu.dot_dimension_numbers<[1], [0], [0], [1], [0, 0, 1, 1], [], []>} : vector<9x5xbf16>, vector<5x256xbf16>, vector<9x256xf32> -> vector<9x256xf32>
    %58 = arith.addf %34, %57 : vector<9x256xf32>
    %c0_24 = arith.constant 0 : index
    %c5_25 = arith.constant 5 : index
    %c1_26 = arith.constant 1 : index
    %59 = vector.load %arg2[%c0_24, %c5_25, %c1_26] : memref<1x9x290xbf16, #tpu.memory_space<vmem>>, vector<1x4x256xbf16>
    %60 = vector.shape_cast %59 : vector<1x4x256xbf16> to vector<4x256xbf16>
    %61 = arith.extf %60 : vector<4x256xbf16> to vector<4x256xf32>
    %cst_27 = arith.constant 0xFF800000 : f32
    %62 = vector.shape_cast %47 : vector<1x256xi1> to vector<1x256xi1>
    %63 = vector.broadcast %62 : vector<1x256xi1> to vector<4x256xi1>
    %64 = vector.broadcast %cst_27 : f32 to vector<4x256xf32>
    %65 = arith.select %63, %61, %64 : vector<4x256xi1>, vector<4x256xf32>
    %66 = arith.maximumf %42, %65 : vector<4x256xf32>
    %c-1_i32 = arith.constant -1 : i32
    %67 = vector.broadcast %c-1_i32 : i32 to vector<1x256xi32>
    %68 = arith.cmpi sge, %16, %67 : vector<1x256xi32>
    %c15_i32 = arith.constant 15 : i32
    %69 = vector.broadcast %c15_i32 : i32 to vector<1x256xi32>
    %70 = arith.cmpi slt, %16, %69 : vector<1x256xi32>
    %71 = arith.andi %68, %70 : vector<1x256xi1>
    %c0_28 = arith.constant 0 : index
    %c0_29 = arith.constant 0 : index
    %c2 = arith.constant 2 : index
    %72 = vector.load %arg2[%c0_28, %c0_29, %c2] : memref<1x9x290xbf16, #tpu.memory_space<vmem>>, vector<1x5x256xbf16>
    %73 = vector.shape_cast %72 : vector<1x5x256xbf16> to vector<5x256xbf16>
    %cst_30 = arith.constant 0.000000e+00 : f32
    %74 = arith.truncf %cst_30 : f32 to bf16
    %75 = vector.shape_cast %71 : vector<1x256xi1> to vector<1x256xi1>
    %76 = vector.broadcast %75 : vector<1x256xi1> to vector<5x256xi1>
    %77 = vector.broadcast %74 : bf16 to vector<5x256xbf16>
    %78 = arith.select %76, %73, %77 : vector<5x256xi1>, vector<5x256xbf16>
    %c2_31 = arith.constant 2 : index
    %c0_32 = arith.constant 0 : index
    %c0_33 = arith.constant 0 : index
    %79 = vector.load %arg3[%c2_31, %c0_32, %c0_33] : memref<9x9x5xbf16, #tpu.memory_space<vmem>>, vector<1x9x5xbf16>
    %80 = vector.shape_cast %79 : vector<1x9x5xbf16> to vector<9x5xbf16>
    %cst_34 = arith.constant dense<0.000000e+00> : vector<9x256xf32>
    %81 = tpu.matmul %80, %78, %cst_34 {dimension_numbers = #tpu.dot_dimension_numbers<[1], [0], [0], [1], [0, 0, 1, 1], [], []>} : vector<9x5xbf16>, vector<5x256xbf16>, vector<9x256xf32> -> vector<9x256xf32>
    %82 = arith.addf %58, %81 : vector<9x256xf32>
    %c0_35 = arith.constant 0 : index
    %c5_36 = arith.constant 5 : index
    %c2_37 = arith.constant 2 : index
    %83 = vector.load %arg2[%c0_35, %c5_36, %c2_37] : memref<1x9x290xbf16, #tpu.memory_space<vmem>>, vector<1x4x256xbf16>
    %84 = vector.shape_cast %83 : vector<1x4x256xbf16> to vector<4x256xbf16>
    %85 = arith.extf %84 : vector<4x256xbf16> to vector<4x256xf32>
    %cst_38 = arith.constant 0xFF800000 : f32
    %86 = vector.shape_cast %71 : vector<1x256xi1> to vector<1x256xi1>
    %87 = vector.broadcast %86 : vector<1x256xi1> to vector<4x256xi1>
    %88 = vector.broadcast %cst_38 : f32 to vector<4x256xf32>
    %89 = arith.select %87, %85, %88 : vector<4x256xi1>, vector<4x256xf32>
    %90 = arith.maximumf %66, %89 : vector<4x256xf32>
    %c1_i32_39 = arith.constant 1 : i32
    %91 = vector.broadcast %c1_i32_39 : i32 to vector<1x256xi32>
    %92 = arith.cmpi sge, %16, %91 : vector<1x256xi32>
    %c17_i32_40 = arith.constant 17 : i32
    %93 = vector.broadcast %c17_i32_40 : i32 to vector<1x256xi32>
    %94 = arith.cmpi slt, %16, %93 : vector<1x256xi32>
    %95 = arith.andi %92, %94 : vector<1x256xi1>
    %c0_41 = arith.constant 0 : index
    %c0_42 = arith.constant 0 : index
    %c16 = arith.constant 16 : index
    %96 = vector.load %arg2[%c0_41, %c0_42, %c16] : memref<1x9x290xbf16, #tpu.memory_space<vmem>>, vector<1x5x256xbf16>
    %97 = vector.shape_cast %96 : vector<1x5x256xbf16> to vector<5x256xbf16>
    %cst_43 = arith.constant 0.000000e+00 : f32
    %98 = arith.truncf %cst_43 : f32 to bf16
    %99 = vector.shape_cast %95 : vector<1x256xi1> to vector<1x256xi1>
    %100 = vector.broadcast %99 : vector<1x256xi1> to vector<5x256xi1>
    %101 = vector.broadcast %98 : bf16 to vector<5x256xbf16>
    %102 = arith.select %100, %97, %101 : vector<5x256xi1>, vector<5x256xbf16>
    %c3 = arith.constant 3 : index
    %c0_44 = arith.constant 0 : index
    %c0_45 = arith.constant 0 : index
    %103 = vector.load %arg3[%c3, %c0_44, %c0_45] : memref<9x9x5xbf16, #tpu.memory_space<vmem>>, vector<1x9x5xbf16>
    %104 = vector.shape_cast %103 : vector<1x9x5xbf16> to vector<9x5xbf16>
    %cst_46 = arith.constant dense<0.000000e+00> : vector<9x256xf32>
    %105 = tpu.matmul %104, %102, %cst_46 {dimension_numbers = #tpu.dot_dimension_numbers<[1], [0], [0], [1], [0, 0, 1, 1], [], []>} : vector<9x5xbf16>, vector<5x256xbf16>, vector<9x256xf32> -> vector<9x256xf32>
    %106 = arith.addf %82, %105 : vector<9x256xf32>
    %c0_47 = arith.constant 0 : index
    %c5_48 = arith.constant 5 : index
    %c16_49 = arith.constant 16 : index
    %107 = vector.load %arg2[%c0_47, %c5_48, %c16_49] : memref<1x9x290xbf16, #tpu.memory_space<vmem>>, vector<1x4x256xbf16>
    %108 = vector.shape_cast %107 : vector<1x4x256xbf16> to vector<4x256xbf16>
    %109 = arith.extf %108 : vector<4x256xbf16> to vector<4x256xf32>
    %cst_50 = arith.constant 0xFF800000 : f32
    %110 = vector.shape_cast %95 : vector<1x256xi1> to vector<1x256xi1>
    %111 = vector.broadcast %110 : vector<1x256xi1> to vector<4x256xi1>
    %112 = vector.broadcast %cst_50 : f32 to vector<4x256xf32>
    %113 = arith.select %111, %109, %112 : vector<4x256xi1>, vector<4x256xf32>
    %114 = arith.maximumf %90, %113 : vector<4x256xf32>
    %c0_i32_51 = arith.constant 0 : i32
    %115 = vector.broadcast %c0_i32_51 : i32 to vector<1x256xi32>
    %116 = arith.cmpi sge, %16, %115 : vector<1x256xi32>
    %c16_i32_52 = arith.constant 16 : i32
    %117 = vector.broadcast %c16_i32_52 : i32 to vector<1x256xi32>
    %118 = arith.cmpi slt, %16, %117 : vector<1x256xi32>
    %119 = arith.andi %116, %118 : vector<1x256xi1>
    %c0_53 = arith.constant 0 : index
    %c0_54 = arith.constant 0 : index
    %c17 = arith.constant 17 : index
    %120 = vector.load %arg2[%c0_53, %c0_54, %c17] : memref<1x9x290xbf16, #tpu.memory_space<vmem>>, vector<1x5x256xbf16>
    %121 = vector.shape_cast %120 : vector<1x5x256xbf16> to vector<5x256xbf16>
    %cst_55 = arith.constant 0.000000e+00 : f32
    %122 = arith.truncf %cst_55 : f32 to bf16
    %123 = vector.shape_cast %119 : vector<1x256xi1> to vector<1x256xi1>
    %124 = vector.broadcast %123 : vector<1x256xi1> to vector<5x256xi1>
    %125 = vector.broadcast %122 : bf16 to vector<5x256xbf16>
    %126 = arith.select %124, %121, %125 : vector<5x256xi1>, vector<5x256xbf16>
    %c4 = arith.constant 4 : index
    %c0_56 = arith.constant 0 : index
    %c0_57 = arith.constant 0 : index
    %127 = vector.load %arg3[%c4, %c0_56, %c0_57] : memref<9x9x5xbf16, #tpu.memory_space<vmem>>, vector<1x9x5xbf16>
    %128 = vector.shape_cast %127 : vector<1x9x5xbf16> to vector<9x5xbf16>
    %cst_58 = arith.constant dense<0.000000e+00> : vector<9x256xf32>
    %129 = tpu.matmul %128, %126, %cst_58 {dimension_numbers = #tpu.dot_dimension_numbers<[1], [0], [0], [1], [0, 0, 1, 1], [], []>} : vector<9x5xbf16>, vector<5x256xbf16>, vector<9x256xf32> -> vector<9x256xf32>
    %130 = arith.addf %106, %129 : vector<9x256xf32>
    %c0_59 = arith.constant 0 : index
    %c5_60 = arith.constant 5 : index
    %c17_61 = arith.constant 17 : index
    %131 = vector.load %arg2[%c0_59, %c5_60, %c17_61] : memref<1x9x290xbf16, #tpu.memory_space<vmem>>, vector<1x4x256xbf16>
    %132 = vector.shape_cast %131 : vector<1x4x256xbf16> to vector<4x256xbf16>
    %133 = arith.extf %132 : vector<4x256xbf16> to vector<4x256xf32>
    %cst_62 = arith.constant 0xFF800000 : f32
    %134 = vector.shape_cast %119 : vector<1x256xi1> to vector<1x256xi1>
    %135 = vector.broadcast %134 : vector<1x256xi1> to vector<4x256xi1>
    %136 = vector.broadcast %cst_62 : f32 to vector<4x256xf32>
    %137 = arith.select %135, %133, %136 : vector<4x256xi1>, vector<4x256xf32>
    %138 = arith.maximumf %114, %137 : vector<4x256xf32>
    %c-1_i32_63 = arith.constant -1 : i32
    %139 = vector.broadcast %c-1_i32_63 : i32 to vector<1x256xi32>
    %140 = arith.cmpi sge, %16, %139 : vector<1x256xi32>
    %c15_i32_64 = arith.constant 15 : i32
    %141 = vector.broadcast %c15_i32_64 : i32 to vector<1x256xi32>
    %142 = arith.cmpi slt, %16, %141 : vector<1x256xi32>
    %143 = arith.andi %140, %142 : vector<1x256xi1>
    %c0_65 = arith.constant 0 : index
    %c0_66 = arith.constant 0 : index
    %c18 = arith.constant 18 : index
    %144 = vector.load %arg2[%c0_65, %c0_66, %c18] : memref<1x9x290xbf16, #tpu.memory_space<vmem>>, vector<1x5x256xbf16>
    %145 = vector.shape_cast %144 : vector<1x5x256xbf16> to vector<5x256xbf16>
    %cst_67 = arith.constant 0.000000e+00 : f32
    %146 = arith.truncf %cst_67 : f32 to bf16
    %147 = vector.shape_cast %143 : vector<1x256xi1> to vector<1x256xi1>
    %148 = vector.broadcast %147 : vector<1x256xi1> to vector<5x256xi1>
    %149 = vector.broadcast %146 : bf16 to vector<5x256xbf16>
    %150 = arith.select %148, %145, %149 : vector<5x256xi1>, vector<5x256xbf16>
    %c5_68 = arith.constant 5 : index
    %c0_69 = arith.constant 0 : index
    %c0_70 = arith.constant 0 : index
    %151 = vector.load %arg3[%c5_68, %c0_69, %c0_70] : memref<9x9x5xbf16, #tpu.memory_space<vmem>>, vector<1x9x5xbf16>
    %152 = vector.shape_cast %151 : vector<1x9x5xbf16> to vector<9x5xbf16>
    %cst_71 = arith.constant dense<0.000000e+00> : vector<9x256xf32>
    %153 = tpu.matmul %152, %150, %cst_71 {dimension_numbers = #tpu.dot_dimension_numbers<[1], [0], [0], [1], [0, 0, 1, 1], [], []>} : vector<9x5xbf16>, vector<5x256xbf16>, vector<9x256xf32> -> vector<9x256xf32>
    %154 = arith.addf %130, %153 : vector<9x256xf32>
    %c0_72 = arith.constant 0 : index
    %c5_73 = arith.constant 5 : index
    %c18_74 = arith.constant 18 : index
    %155 = vector.load %arg2[%c0_72, %c5_73, %c18_74] : memref<1x9x290xbf16, #tpu.memory_space<vmem>>, vector<1x4x256xbf16>
    %156 = vector.shape_cast %155 : vector<1x4x256xbf16> to vector<4x256xbf16>
    %157 = arith.extf %156 : vector<4x256xbf16> to vector<4x256xf32>
    %cst_75 = arith.constant 0xFF800000 : f32
    %158 = vector.shape_cast %143 : vector<1x256xi1> to vector<1x256xi1>
    %159 = vector.broadcast %158 : vector<1x256xi1> to vector<4x256xi1>
    %160 = vector.broadcast %cst_75 : f32 to vector<4x256xf32>
    %161 = arith.select %159, %157, %160 : vector<4x256xi1>, vector<4x256xf32>
    %162 = arith.maximumf %138, %161 : vector<4x256xf32>
    %c1_i32_76 = arith.constant 1 : i32
    %163 = vector.broadcast %c1_i32_76 : i32 to vector<1x256xi32>
    %164 = arith.cmpi sge, %16, %163 : vector<1x256xi32>
    %c17_i32_77 = arith.constant 17 : i32
    %165 = vector.broadcast %c17_i32_77 : i32 to vector<1x256xi32>
    %166 = arith.cmpi slt, %16, %165 : vector<1x256xi32>
    %167 = arith.andi %164, %166 : vector<1x256xi1>
    %c0_78 = arith.constant 0 : index
    %c0_79 = arith.constant 0 : index
    %c32 = arith.constant 32 : index
    %168 = vector.load %arg2[%c0_78, %c0_79, %c32] : memref<1x9x290xbf16, #tpu.memory_space<vmem>>, vector<1x5x256xbf16>
    %169 = vector.shape_cast %168 : vector<1x5x256xbf16> to vector<5x256xbf16>
    %cst_80 = arith.constant 0.000000e+00 : f32
    %170 = arith.truncf %cst_80 : f32 to bf16
    %171 = vector.shape_cast %167 : vector<1x256xi1> to vector<1x256xi1>
    %172 = vector.broadcast %171 : vector<1x256xi1> to vector<5x256xi1>
    %173 = vector.broadcast %170 : bf16 to vector<5x256xbf16>
    %174 = arith.select %172, %169, %173 : vector<5x256xi1>, vector<5x256xbf16>
    %c6 = arith.constant 6 : index
    %c0_81 = arith.constant 0 : index
    %c0_82 = arith.constant 0 : index
    %175 = vector.load %arg3[%c6, %c0_81, %c0_82] : memref<9x9x5xbf16, #tpu.memory_space<vmem>>, vector<1x9x5xbf16>
    %176 = vector.shape_cast %175 : vector<1x9x5xbf16> to vector<9x5xbf16>
    %cst_83 = arith.constant dense<0.000000e+00> : vector<9x256xf32>
    %177 = tpu.matmul %176, %174, %cst_83 {dimension_numbers = #tpu.dot_dimension_numbers<[1], [0], [0], [1], [0, 0, 1, 1], [], []>} : vector<9x5xbf16>, vector<5x256xbf16>, vector<9x256xf32> -> vector<9x256xf32>
    %178 = arith.addf %154, %177 : vector<9x256xf32>
    %c0_84 = arith.constant 0 : index
    %c5_85 = arith.constant 5 : index
    %c32_86 = arith.constant 32 : index
    %179 = vector.load %arg2[%c0_84, %c5_85, %c32_86] : memref<1x9x290xbf16, #tpu.memory_space<vmem>>, vector<1x4x256xbf16>
    %180 = vector.shape_cast %179 : vector<1x4x256xbf16> to vector<4x256xbf16>
    %181 = arith.extf %180 : vector<4x256xbf16> to vector<4x256xf32>
    %cst_87 = arith.constant 0xFF800000 : f32
    %182 = vector.shape_cast %167 : vector<1x256xi1> to vector<1x256xi1>
    %183 = vector.broadcast %182 : vector<1x256xi1> to vector<4x256xi1>
    %184 = vector.broadcast %cst_87 : f32 to vector<4x256xf32>
    %185 = arith.select %183, %181, %184 : vector<4x256xi1>, vector<4x256xf32>
    %186 = arith.maximumf %162, %185 : vector<4x256xf32>
    %c0_i32_88 = arith.constant 0 : i32
    %187 = vector.broadcast %c0_i32_88 : i32 to vector<1x256xi32>
    %188 = arith.cmpi sge, %16, %187 : vector<1x256xi32>
    %c16_i32_89 = arith.constant 16 : i32
    %189 = vector.broadcast %c16_i32_89 : i32 to vector<1x256xi32>
    %190 = arith.cmpi slt, %16, %189 : vector<1x256xi32>
    %191 = arith.andi %188, %190 : vector<1x256xi1>
    %c0_90 = arith.constant 0 : index
    %c0_91 = arith.constant 0 : index
    %c33 = arith.constant 33 : index
    %192 = vector.load %arg2[%c0_90, %c0_91, %c33] : memref<1x9x290xbf16, #tpu.memory_space<vmem>>, vector<1x5x256xbf16>
    %193 = vector.shape_cast %192 : vector<1x5x256xbf16> to vector<5x256xbf16>
    %cst_92 = arith.constant 0.000000e+00 : f32
    %194 = arith.truncf %cst_92 : f32 to bf16
    %195 = vector.shape_cast %191 : vector<1x256xi1> to vector<1x256xi1>
    %196 = vector.broadcast %195 : vector<1x256xi1> to vector<5x256xi1>
    %197 = vector.broadcast %194 : bf16 to vector<5x256xbf16>
    %198 = arith.select %196, %193, %197 : vector<5x256xi1>, vector<5x256xbf16>
    %c7 = arith.constant 7 : index
    %c0_93 = arith.constant 0 : index
    %c0_94 = arith.constant 0 : index
    %199 = vector.load %arg3[%c7, %c0_93, %c0_94] : memref<9x9x5xbf16, #tpu.memory_space<vmem>>, vector<1x9x5xbf16>
    %200 = vector.shape_cast %199 : vector<1x9x5xbf16> to vector<9x5xbf16>
    %cst_95 = arith.constant dense<0.000000e+00> : vector<9x256xf32>
    %201 = tpu.matmul %200, %198, %cst_95 {dimension_numbers = #tpu.dot_dimension_numbers<[1], [0], [0], [1], [0, 0, 1, 1], [], []>} : vector<9x5xbf16>, vector<5x256xbf16>, vector<9x256xf32> -> vector<9x256xf32>
    %202 = arith.addf %178, %201 : vector<9x256xf32>
    %c0_96 = arith.constant 0 : index
    %c5_97 = arith.constant 5 : index
    %c33_98 = arith.constant 33 : index
    %203 = vector.load %arg2[%c0_96, %c5_97, %c33_98] : memref<1x9x290xbf16, #tpu.memory_space<vmem>>, vector<1x4x256xbf16>
    %204 = vector.shape_cast %203 : vector<1x4x256xbf16> to vector<4x256xbf16>
    %205 = arith.extf %204 : vector<4x256xbf16> to vector<4x256xf32>
    %cst_99 = arith.constant 0xFF800000 : f32
    %206 = vector.shape_cast %191 : vector<1x256xi1> to vector<1x256xi1>
    %207 = vector.broadcast %206 : vector<1x256xi1> to vector<4x256xi1>
    %208 = vector.broadcast %cst_99 : f32 to vector<4x256xf32>
    %209 = arith.select %207, %205, %208 : vector<4x256xi1>, vector<4x256xf32>
    %210 = arith.maximumf %186, %209 : vector<4x256xf32>
    %c-1_i32_100 = arith.constant -1 : i32
    %211 = vector.broadcast %c-1_i32_100 : i32 to vector<1x256xi32>
    %212 = arith.cmpi sge, %16, %211 : vector<1x256xi32>
    %c15_i32_101 = arith.constant 15 : i32
    %213 = vector.broadcast %c15_i32_101 : i32 to vector<1x256xi32>
    %214 = arith.cmpi slt, %16, %213 : vector<1x256xi32>
    %215 = arith.andi %212, %214 : vector<1x256xi1>
    %c0_102 = arith.constant 0 : index
    %c0_103 = arith.constant 0 : index
    %c34 = arith.constant 34 : index
    %216 = vector.load %arg2[%c0_102, %c0_103, %c34] : memref<1x9x290xbf16, #tpu.memory_space<vmem>>, vector<1x5x256xbf16>
    %217 = vector.shape_cast %216 : vector<1x5x256xbf16> to vector<5x256xbf16>
    %cst_104 = arith.constant 0.000000e+00 : f32
    %218 = arith.truncf %cst_104 : f32 to bf16
    %219 = vector.shape_cast %215 : vector<1x256xi1> to vector<1x256xi1>
    %220 = vector.broadcast %219 : vector<1x256xi1> to vector<5x256xi1>
    %221 = vector.broadcast %218 : bf16 to vector<5x256xbf16>
    %222 = arith.select %220, %217, %221 : vector<5x256xi1>, vector<5x256xbf16>
    %c8 = arith.constant 8 : index
    %c0_105 = arith.constant 0 : index
    %c0_106 = arith.constant 0 : index
    %223 = vector.load %arg3[%c8, %c0_105, %c0_106] : memref<9x9x5xbf16, #tpu.memory_space<vmem>>, vector<1x9x5xbf16>
    %224 = vector.shape_cast %223 : vector<1x9x5xbf16> to vector<9x5xbf16>
    %cst_107 = arith.constant dense<0.000000e+00> : vector<9x256xf32>
    %225 = tpu.matmul %224, %222, %cst_107 {dimension_numbers = #tpu.dot_dimension_numbers<[1], [0], [0], [1], [0, 0, 1, 1], [], []>} : vector<9x5xbf16>, vector<5x256xbf16>, vector<9x256xf32> -> vector<9x256xf32>
    %226 = arith.addf %202, %225 : vector<9x256xf32>
    %c0_108 = arith.constant 0 : index
    %c5_109 = arith.constant 5 : index
    %c34_110 = arith.constant 34 : index
    %227 = vector.load %arg2[%c0_108, %c5_109, %c34_110] : memref<1x9x290xbf16, #tpu.memory_space<vmem>>, vector<1x4x256xbf16>
    %228 = vector.shape_cast %227 : vector<1x4x256xbf16> to vector<4x256xbf16>
    %229 = arith.extf %228 : vector<4x256xbf16> to vector<4x256xf32>
    %cst_111 = arith.constant 0xFF800000 : f32
    %230 = vector.shape_cast %215 : vector<1x256xi1> to vector<1x256xi1>
    %231 = vector.broadcast %230 : vector<1x256xi1> to vector<4x256xi1>
    %232 = vector.broadcast %cst_111 : f32 to vector<4x256xf32>
    %233 = arith.select %231, %229, %232 : vector<4x256xi1>, vector<4x256xf32>
    %234 = arith.maximumf %210, %233 : vector<4x256xf32>
    %235 = vector.extract_strided_slice %226 {offsets = [8, 0], sizes = [1, 256], strides = [1, 1]} : vector<9x256xf32> to vector<1x256xf32>
    %cst_112 = arith.constant 9.99999993E-9 : f32
    %236 = vector.broadcast %cst_112 : f32 to vector<1x256xf32>
    %237 = arith.addf %235, %236 : vector<1x256xf32>
    %cst_113 = arith.constant 1.000000e+00 : f32
    %238 = vector.broadcast %cst_113 : f32 to vector<1x256xf32>
    %239 = arith.divf %238, %237 : vector<1x256xf32>
    %240 = vector.extract_strided_slice %226 {offsets = [0, 0], sizes = [8, 256], strides = [1, 1]} : vector<9x256xf32> to vector<8x256xf32>
    %241 = vector.broadcast %239 : vector<1x256xf32> to vector<8x256xf32>
    %242 = arith.mulf %240, %241 : vector<8x256xf32>
    %c0_114 = arith.constant 0 : index
    %c0_115 = arith.constant 0 : index
    %243 = vector.load %arg4[%c0_114, %c0_115] : memref<8x1xf32, #tpu.memory_space<vmem>>, vector<8x1xf32>
    %244 = vector.broadcast %243 : vector<8x1xf32> to vector<8x256xf32>
    %245 = arith.addf %242, %244 : vector<8x256xf32>
    %cst_116 = arith.constant 0.000000e+00 : f32
    %246 = vector.broadcast %cst_116 : f32 to vector<8x256xf32>
    %247 = arith.maximumf %245, %246 : vector<8x256xf32>
    %c0_117 = arith.constant 0 : index
    %c0_118 = arith.constant 0 : index
    %c0_119 = arith.constant 0 : index
    %248 = vector.load %arg5[%c0_117, %c0_118, %c0_119] : memref<1x8x256xf32, #tpu.memory_space<vmem>>, vector<1x8x256xf32>
    %249 = vector.shape_cast %248 : vector<1x8x256xf32> to vector<8x256xf32>
    %250 = vector.shape_cast %247 : vector<8x256xf32> to vector<1x8x256xf32>
    tpu.vector_store %arg5[%c0_117, %c0_118, %c0_119], %250 {strides = array<i32>} : memref<1x8x256xf32, #tpu.memory_space<vmem>>, vector<1x8x256xf32>,
    %c0_120 = arith.constant 0 : index
    %c0_121 = arith.constant 0 : index
    %c0_122 = arith.constant 0 : index
    %251 = vector.load %arg6[%c0_120, %c0_121, %c0_122] : memref<1x4x256xf32, #tpu.memory_space<vmem>>, vector<1x4x256xf32>
    %252 = vector.shape_cast %251 : vector<1x4x256xf32> to vector<4x256xf32>
    %253 = vector.shape_cast %234 : vector<4x256xf32> to vector<1x4x256xf32>
    tpu.vector_store %arg6[%c0_120, %c0_121, %c0_122], %253 {strides = array<i32>} : memref<1x4x256xf32, #tpu.memory_space<vmem>>, vector<1x4x256xf32>,
    return
  }
  func.func @transform_0(%arg0: i32, %arg1: i32) -> (i32, i32, i32) {
    %c1_i32 = arith.constant 1 : i32
    %0 = arith.muli %arg0, %c1_i32 : i32
    %1 = arith.addi %0, %arg1 : i32
    %c0_i32 = arith.constant 0 : i32
    %c0_i32_0 = arith.constant 0 : i32
    %c0_i32_1 = arith.constant 0 : i32
    return %1, %c0_i32, %c0_i32_0 : i32, i32, i32
  }
  func.func @transform_1(%arg0: i32, %arg1: i32) -> (i32, i32, i32) {
    %c0_i32 = arith.constant 0 : i32
    %c0_i32_0 = arith.constant 0 : i32
    %c0_i32_1 = arith.constant 0 : i32
    %c0_i32_2 = arith.constant 0 : i32
    return %c0_i32, %c0_i32_0, %c0_i32_1 : i32, i32, i32
  }
  func.func @transform_2(%arg0: i32, %arg1: i32) -> (i32, i32) {
    %c0_i32 = arith.constant 0 : i32
    %c0_i32_0 = arith.constant 0 : i32
    %c0_i32_1 = arith.constant 0 : i32
    return %c0_i32, %c0_i32_0 : i32, i32
  }
  func.func @transform_3(%arg0: i32, %arg1: i32) -> (i32, i32, i32) {
    %c0_i32 = arith.constant 0 : i32
    %c0_i32_0 = arith.constant 0 : i32
    return %arg0, %c0_i32, %arg1 : i32, i32, i32
  }
  func.func @transform_4(%arg0: i32, %arg1: i32) -> (i32, i32, i32) {
    %c0_i32 = arith.constant 0 : i32
    %c0_i32_0 = arith.constant 0 : i32
    return %arg0, %c0_i32, %arg1 : i32, i32, i32
  }
}

</mosaic_0001>

<bundles_post_ra>
// kernel: tpu_custom_call.1
= control target key start
LH: loop header
LB: loop body
LE: loop exit
PB: predicated region body
PF: predicated region fallthrough
CT: control target
= control target key end

     0   :  { %10 = vsyncpa [#allocation3], 0  ;;  %s2417_s0 = inlined_call_operand.vmem [shape: bf16[2,9,290], index: 0, kind: input, shape index: {}]   ;;  %s2418_s1 = inlined_call_operand.vmem [shape: bf16[9,9,5], index: 1, kind: input, shape index: {}]   ;;  %s2419_s2 = inlined_call_operand.vmem [shape: f32[8,1], index: 2, kind: input, shape index: {}]   ;;  %s2420_s3 = inlined_call_operand.hbm [shape: f32[2,8,256], index: 3, kind: output, shape index: {0}]   ;;  %s2421_s4 = inlined_call_operand.hbm [shape: f32[2,4,256], index: 4, kind: output, shape index: {1}]  }
   0x1   :  { %12 = vsyncpa [#allocation3 + $0x1], 0 }
   0x2   :  { %13 = vsyncpa [#allocation5], 0 }
   0x3   :  { %15 = vsyncpa [#allocation5 + $0x1], 0  ;;  %s1860_s15 = smov 0   ;;  %s1862_s16 = smov 0  }
   0x4   :  { %s1864_s17 = smov 0   ;;  %s1866_s18 = smov 0  }
   0x5   :  { %s1868_s19 = smov 0   ;;  %s1870_s20 = smov 0  }
   0x6 LB: > { %s1481_s21 = sadd.s32 4294967295, %s1814_s20   ;;  %s1482_s22 = sadd.s32 4294967294, %s1814_s20   ;;  %s1814_s20 = sphi %s1870_s20, %s21_s20   ;;  %s1810_s19 = sphi %s1868_s19, %s2485_s19   ;;  %s1806_s18 = sphi %s1866_s18, %s2484_s18   ;;  %s1802_s17 = sphi %s1864_s17, %s2483_s17   ;;  %s1798_s16 = sphi %s1862_s16, %s2482_s16   ;;  %s1794_s15 = sphi %s1860_s15, %s2481_s15  }
   0x7   : > { %s33_s23 = sadd.s32 1, %s1810_s19  ;;  %s112_s24 = sadd.s32 1, %s1802_s17 }
   0x8   : > { %p35_p0 = scmp.ge.s32.totalorder %s33_s23, 2  ;;  %p122_p1 = scmp.ne.s32.totalorder %s1802_s17, %s1798_s16 }
   0x9   : > { %p123_p2 = scmp.eq.s32.totalorder %s1481_s21, 1  ;;  %p128_p3 = scmp.ne.s32.totalorder %s1798_s16, %s1794_s15 }
   0xa   : > { %s2487_s23 = smov (%p35_p0, %s33_s23), 0  ;;  %p129_p5 = scmp.eq.s32.totalorder %s1482_s22, 1 }
   0xb   : > { %p1900_p4 = por %p123_p2, %p122_p1  ;;  %s107_s26 = ssub.s32 %s1810_s19, %s2487_s23 }
   0xc   : > { %p1485_p6 = scmp.ge.s32.totalorder %s1814_s20, 1  ;;  %p110_p7 = scmp.eq.s32.totalorder %s107_s26, 0 }
   0xd   : > { %p1907_p8 = por %p129_p5, %p128_p3  ;;  %p191_p9 = scmp.lt.s32.totalorder %s1814_s20, 3 }
   0xe   : > { %s1913_s28 = scalar_select %p110_p7, %s1802_s17, %s112_s24  }
   0xf   : > { %p192_p10 = pnand %p1485_p6, %p191_p9 }
  0x10   : > { %s1818_s29 = smov (!%p192_p10), 1   ;;  %s1819_s30 = smov (!%p192_p10), 2  }
  0x11   : > { %195 = sbr.rel (%p192_p10) target bundleno = 583 (0x247), region = 32  ;;  %s1820_s5 = smov (!%p192_p10), 18  }
  0x12   : > { %s1821_s6 = smov (!%p192_p10), 16   ;;  %s1822_s7 = smov (!%p192_p10), 32  }
  0x13   : > { %s1823_s8 = smov (!%p192_p10), 17   ;;  %p224_p11 = scmp.lt.s32.totalorder (!%p192_p10), %s1806_s18, 1 }
  0x14   : > { %s1824_s14 = smov (!%p192_p10), 127   ;;  %s1825_s21 = smov (!%p192_p10), 33  }
  0x15   : > { %s1826_s22 = smov (!%p192_p10), 34   ;;  %s1827_s24 = smov (!%p192_p10), 126  }
  0x16   : > { %v235_v0 = vlaneseq  ;;  %vm1816_vm0 = vmmov 1   ;;  %v1817_v1 = vmov 0   ;;  %s225_s9 = scalar_select %p224_p11, %s1806_s18, 1  ;;  %vm303_vm8 = vcmask 7168  }
  0x17   : > { %vm298_vm1 = vmpackc.low %vm1816_vm0, %vm1816_vm0  ;;  %1699 = vset.pattern.permute.xlu0 %v1817_v1  ;;  %v1954_v14 = vunpack.c.l.b16 %v1817_v1  ;;  %v1956_v15 = vunpack.c.h.b16 %v1817_v1  ;;  %vm498_vm15 = vcmask 15360   ;;  %vm609_vm0 = vcmask 130048   ;;  %s1828_s26 = smov 112  }
  0x18   : > { %v1915_v2 = vsel %vm298_vm1, 65537, %v1817_v1  ;;  %v236_v3 = vand.u32 127, %v235_v0  ;;  %s1579_s10 = smul.u32 24, %s225_s9  ;;  %s2425_s9 = smov 95  }
  0x19   : > { %300 = vrot.lane.b32.xlu0 %v1915_v2, %s1818_s29  ;;  %s1829_s29 = smov 111  }
  0x1a   : > { %v237_v4 = vadd.s32 128, %v236_v3  ;;  %v242_v5 = vand.u32 15, %v236_v3  ;;  %s1961_s13 = scalar_lea.vmem %s2417_s0, %s1579_s10  ;;  %s2474_s10 = smov 95  }
  0x1b   : > { %v1964_v22 = vld [vmem:[%s1961_s13 + $0x8] sm:$0x7]  ;;  %v1967_v23 = vld [vmem:[%s1961_s13] sm:$0x77] }
  0x1c   : > { %v249_v6 = vand.u32 15, %v237_v4  ;;  %vm1918_vm2 = vcmp.lt.s32.totalorder %v242_v5, 15  ;;  %vm1922_vm3 = vcmp.ge.s32.totalorder %v242_v5, 1 }
  0x1e   : > { %vm1926_vm4 = vcmp.lt.s32.totalorder %v249_v6, 15  ;;  %vm1930_vm5 = vcmp.ge.s32.totalorder %v249_v6, 1  ;;  %v1499_v6 = vld [vmem:[%s2418_s1] sm:$0xf] }
  0x1f   : > { %vm493_vm6 = vmpackc.low %vm1926_vm4, %vm1918_vm2 }
  0x20   : > { %v1938_v11 = vsel %vm493_vm6, 65537, %v1817_v1  ;;  %vm273_vm7 = vmpackc.low %vm1930_vm5, %vm1922_vm3 }
  0x21   : > { %495 = vrot.lane.b32.xlu0 %v1938_v11, %s1819_s30  ;;  %v605_v12 = vsel %vm273_vm7, 65537, %v1817_v1  ;;  %826 = vrot.lane.b32.xlu2 %v1938_v11, %s1820_s5  ;;  %s1830_s30 = smov 110   ;;  %s1831_s5 = smov 96  }
  0x22   : > { %606 = vrot.lane.b32.xlu1 %v605_v12, %s1821_s6 }
  0x29   : > { %936 = vrot.lane.b32.xlu2 %v605_v12, %s1822_s7 }
  0x2a   : > { %716 = vrot.lane.b32.xlu1 %v1915_v2, %s1823_s8 }
  0x7b   : > { %v827_v58 = vpop.permute.xlu2 %826 }
  0x7c   : > { %v828_v63 = vrot.slane %v827_v58, 4 }
  0x8b   : > { %v301_v13 = vpop.permute.xlu0 %300 }
  0x8c   : > { %v302_v16 = vrot.slane %v301_v13, 4 }
  0x8e   : > { %v304_v17 = vsel %vm303_vm8, %v302_v16, %v301_v13  ;;  %v312_v18 = vunpack.c.l.b16 %v302_v16  ;;  %v313_v19 = vunpack.c.h.b16 %v302_v16 }
  0x8f   : > { %v305_v20 = vunpack.c.l.b16 %v304_v17  ;;  %v306_v21 = vunpack.c.h.b16 %v304_v17 }
  0x90   : > { %vm316_vm9 = vcmp.ne.s32.totalorder %v312_v18, %v1954_v14  ;;  %vm317_vm10 = vcmp.ne.s32.totalorder %v313_v19, %v1956_v15 }
  0x91   : > { %vm309_vm11 = vcmp.ne.s32.totalorder %v305_v20, %v1954_v14  ;;  %vm310_vm12 = vcmp.ne.s32.totalorder %v306_v21, %v1956_v15  ;;  %vm318_vm13 = vmpackc.low %vm317_vm10, %vm316_vm9  ;;  %v838_v20 = vunpack.c.l.b16 %v828_v63  ;;  %v839_v21 = vunpack.c.h.b16 %v828_v63 }
  0x92   : > { %vm311_vm14 = vmpackc.low %vm310_vm12, %vm309_vm11  ;;  %v320_v24 = vsel %vm318_vm13, %v1964_v22, 0  ;;  %vm719_vm12 = vcmask 138240  }
  0x93   : > { %v333_v25 = vunpack.c.l.b16 %v320_v24  ;;  %v319_v26 = vsel %vm311_vm14, %v1967_v23, 0  ;;  %v496_v27 = vpop.permute.xlu0 %495 }
  0x94   : > { %v332_v28 = vunpack.c.h.b16 %v319_v26  ;;  %v331_v29 = vunpack.c.l.b16 %v319_v26  ;;  %v497_v30 = vrot.slane %v496_v27, 4  ;;  %v607_v31 = vpop.permute.xlu1 %606 }
  0x95   : > { %v336_v32 = vpack.c.b16 %v333_v25, %v333_v25  ;;  %v608_v33 = vrot.slane %v607_v31, 4 }
  0x96   : > { %v335_v34 = vpack.c.b16 %v332_v28, %v332_v28  ;;  %v334_v35 = vpack.c.b16 %v331_v29, %v331_v29  ;;  %v499_v36 = vsel %vm498_vm15, %v497_v30, %v496_v27  ;;  %v507_v37 = vunpack.c.l.b16 %v497_v30 }
  0x97   : > { %341 = vrot.lane.b32.xlu2 %v336_v32, %s1824_s14  ;;  %v500_v38 = vunpack.c.l.b16 %v499_v36  ;;  %v501_v39 = vunpack.c.h.b16 %v499_v36  ;;  %v508_v40 = vunpack.c.h.b16 %v497_v30  ;;  %v610_v41 = vsel %vm609_vm0, %v608_v33, %v607_v31  ;;  %v937_v32 = vpop.permute.xlu2 %936 }
  0x98   : > { %339 = vrot.lane.b32.xlu1 %v335_v34, %s1824_s14  ;;  %337 = vrot.lane.b32.xlu0 %v334_v35, %s1824_s14  ;;  %vm511_vm8 = vcmp.ne.s32.totalorder %v507_v37, %v1954_v14  ;;  %v611_v42 = vunpack.c.l.b16 %v610_v41  ;;  %v612_v43 = vunpack.c.h.b16 %v610_v41  ;;  %v618_v44 = vunpack.c.l.b16 %v608_v33 }
  0x99   : > { %vm504_vm1 = vcmp.ne.s32.totalorder %v500_v38, %v1954_v14  ;;  %vm505_vm6 = vcmp.ne.s32.totalorder %v501_v39, %v1956_v15  ;;  %vm512_vm9 = vcmp.ne.s32.totalorder %v508_v40, %v1956_v15  ;;  %v619_v45 = vunpack.c.h.b16 %v608_v33 }
  0x9a   : > { %vm506_vm10 = vmpackc.low %vm505_vm6, %vm504_vm1  ;;  %vm1985_vm13 = vcmp.ne.s32.totalorder %v611_v42, %v1954_v14  ;;  %vm1990_vm14 = vcmp.ne.s32.totalorder %v612_v43, %v1956_v15  ;;  %vm1995_vm15 = vcmp.ne.s32.totalorder %v618_v44, %v1954_v14  ;;  %v938_v33 = vrot.slane %v937_v32, 4 }
  0x9b   : > { %vm513_vm11 = vmpackc.low %vm512_vm9, %vm511_vm8  ;;  %v514_v48 = vsel %vm506_vm10, %v1967_v23, 0  ;;  %vm2000_vm0 = vcmp.ne.s32.totalorder %v619_v45, %v1956_v15  ;;  %vm829_vm8 = vcmask 146432  }
  0x9c   : > { %v717_v46 = vpop.permute.xlu1 %716  ;;  %v515_v47 = vsel %vm513_vm11, %v1964_v22, 0  ;;  %v526_v54 = vunpack.c.l.b16 %v514_v48  ;;  %v527_v56 = vunpack.c.h.b16 %v514_v48  ;;  %vm617_vm1 = vmpackc.low %vm1990_vm14, %vm1985_vm13  ;;  %v830_v13 = vsel %vm829_vm8, %v828_v63, %v827_v58 }
  0x9d   : > { %v718_v49 = vrot.slane %v717_v46, 4  ;;  %v528_v55 = vunpack.c.l.b16 %v515_v47  ;;  %vm624_vm6 = vmpackc.low %vm2000_vm0, %vm1995_vm15  ;;  %v2016_v4 = vsel %vm617_vm1, %v1967_v23, 0  ;;  %v831_v18 = vunpack.c.l.b16 %v830_v13 }
  0x9e   : > { %v529_v0 = vpack.c.b16 %v526_v54, %v526_v54  ;;  %v626_v3 = vsel %vm624_vm6, %v1964_v22, 0  ;;  %v638_v17 = vunpack.c.h.b16 %v2016_v4  ;;  %v832_v19 = vunpack.c.h.b16 %v830_v13 }
  0x9f   : > { %v720_v57 = vsel %vm719_vm12, %v718_v49, %v717_v46  ;;  %v728_v59 = vunpack.c.l.b16 %v718_v49  ;;  %v729_v60 = vunpack.c.h.b16 %v718_v49  ;;  %v531_v1 = vpack.c.b16 %v528_v55, %v528_v55 }
  0xa0   : > { %1046 = vrot.lane.b32.xlu0 %v1915_v2, %s1825_s21  ;;  %1156 = vrot.lane.b32.xlu1 %v1938_v11, %s1826_s22  ;;  %v721_v61 = vunpack.c.l.b16 %v720_v57  ;;  %v722_v62 = vunpack.c.h.b16 %v720_v57  ;;  %v530_v2 = vpack.c.b16 %v527_v56, %v527_v56  ;;  %v639_v16 = vunpack.c.l.b16 %v626_v3  ;;  %v1568_v11 = vld [vmem:[%s2418_s1] sm:$0x10]  ;;  %s1834_s22 = smov 94   ;;  %s1724_s21 = scalar_lea.hbm %s2421_s4, 16 }
  0xa1   : > { %532 = vrot.lane.b32.xlu2 %v529_v0, %s1827_s24  ;;  %vm2020_vm9 = vcmp.ne.s32.totalorder %v728_v59, %v1954_v14  ;;  %vm2025_vm10 = vcmp.ne.s32.totalorder %v729_v60, %v1956_v15  ;;  %v641_v25 = vpack.c.b16 %v638_v17, %v638_v17  ;;  %vm2053_vm15 = vcmp.ne.s32.totalorder %v831_v18, %v1954_v14  ;;  %v1569_v17 = vld [vmem:[%s2418_s1 + $0x8] sm:$0x10] }
  0xa2   : > { %vm2030_vm11 = vcmp.ne.s32.totalorder %v721_v61, %v1954_v14  ;;  %vm2035_vm12 = vcmp.ne.s32.totalorder %v722_v62, %v1956_v15  ;;  %vm734_vm13 = vmpackc.low %vm2025_vm10, %vm2020_vm9  ;;  %v642_v24 = vpack.c.b16 %v639_v16, %v639_v16  ;;  %vm2058_vm0 = vcmp.ne.s32.totalorder %v832_v19, %v1956_v15  ;;  %v1493_v16 = vld [vmem:[%s2418_s1 + $0x8] sm:$0xf] }
  0xa3   : > { %vm727_vm14 = vmpackc.low %vm2035_vm12, %vm2030_vm11  ;;  %v736_v26 = vsel %vm734_vm13, %v1964_v22, 0  ;;  %vm842_vm1 = vcmp.ne.s32.totalorder %v838_v20, %v1954_v14  ;;  %vm843_vm6 = vcmp.ne.s32.totalorder %v839_v21, %v1956_v15  ;;  %vm939_vm10 = vcmask 261120  }
  0xa4   : > { %v735_v27 = vsel %vm727_vm14, %v1967_v23, 0  ;;  %v749_v30 = vunpack.c.l.b16 %v736_v26  ;;  %vm837_vm8 = vmpackc.low %vm2058_vm0, %vm2053_vm15  ;;  %v940_v38 = vsel %vm939_vm10, %v938_v33, %v937_v32  ;;  %v948_v45 = vunpack.c.l.b16 %v938_v33 }
  0xa5   : > { %v748_v31 = vunpack.c.h.b16 %v735_v27  ;;  %vm844_vm9 = vmpackc.low %vm843_vm6, %vm842_vm1  ;;  %v845_v37 = vsel %vm837_vm8, %v1967_v23, 0  ;;  %v941_v41 = vunpack.c.l.b16 %v940_v38  ;;  %v942_v42 = vunpack.c.h.b16 %v940_v38 }
  0xa6   : > { %v752_v34 = vpack.c.b16 %v749_v30, %v749_v30  ;;  %v846_v36 = vsel %vm844_vm9, %v1964_v22, 0  ;;  %v858_v40 = vunpack.c.h.b16 %v845_v37  ;;  %v949_v46 = vunpack.c.h.b16 %v938_v33 }
  0xa7   : > { %v751_v35 = vpack.c.b16 %v748_v31, %v748_v31  ;;  %v859_v39 = vunpack.c.l.b16 %v846_v36  ;;  %vm945_vm11 = vcmp.ne.s32.totalorder %v941_v41, %v1954_v14  ;;  %vm946_vm12 = vcmp.ne.s32.totalorder %v942_v42, %v1956_v15 }
  0xa8   : > { %536 = vrot.lane.b32.xlu1 %v531_v1, %s1827_s24  ;;  %534 = vrot.lane.b32.xlu0 %v530_v2, %s1827_s24  ;;  %v861_v44 = vpack.c.b16 %v858_v40, %v858_v40  ;;  %vm947_vm13 = vmpackc.low %vm946_vm12, %vm945_vm11  ;;  %vm952_vm14 = vcmp.ne.s32.totalorder %v948_v45, %v1954_v14  ;;  %vm953_vm15 = vcmp.ne.s32.totalorder %v949_v46, %v1956_v15  ;;  %v637_v49 = vunpack.c.l.b16 %v2016_v4 }
  0xa9   : > { %v862_v43 = vpack.c.b16 %v859_v39, %v859_v39  ;;  %vm954_vm0 = vmpackc.low %vm953_vm15, %vm952_vm14  ;;  %v955_v48 = vsel %vm947_vm13, %v1967_v23, 0  ;;  %v747_v55 = vunpack.c.l.b16 %v735_v27  ;;  %v857_v57 = vunpack.c.l.b16 %v845_v37 }
  0xaa   : > { %v956_v47 = vsel %vm954_vm0, %v1964_v22, 0  ;;  %v968_v51 = vunpack.c.h.b16 %v955_v48  ;;  %v640_v52 = vpack.c.b16 %v637_v49, %v637_v49  ;;  %v967_v59 = vunpack.c.l.b16 %v955_v48 }
  0xab   : > { %v969_v50 = vunpack.c.l.b16 %v956_v47  ;;  %v750_v56 = vpack.c.b16 %v747_v55, %v747_v55  ;;  %v860_v58 = vpack.c.b16 %v857_v57, %v857_v57  ;;  %vm350_vm1 = vcmask 1041408  }
  0xac   : > { %v971_v54 = vpack.c.b16 %v968_v51, %v968_v51  ;;  %643 = vrot.lane.b32.xlu2 %v640_v52, %s1828_s26  ;;  %v970_v60 = vpack.c.b16 %v967_v59, %v967_v59  ;;  %v274_v61 = vsel %vm273_vm7, %v1967_v23, 0  ;;  %vm2423_vm6 = vcmask 1042432  }
  0xad   : > { %v972_v53 = vpack.c.b16 %v969_v50, %v969_v50  ;;  %v1832_v62 = vmov 65535   ;;  %v394_v0 = vunpack.c.l.b16 %v274_v61  ;;  %v395_v1 = vunpack.c.h.b16 %v274_v61 }
  0xae   : > { %v352_v63 = vsel %vm350_vm1, 4294967295, %v1832_v62  ;;  %vm2422_vm8 = vcmask 1039360   ;;  %v1500_v26 = vor.u32 %v1568_v11, %v1499_v6  ;;  %v1494_v27 = vor.u32 %v1569_v17, %v1493_v16 }
  0xaf   : > { %v2096_v3 = vsel %vm2423_vm6, %v352_v63, 0  ;;  %v396_v4 = vpack.c.b16 %v394_v0, %v394_v0  ;;  %v397_v5 = vpack.c.b16 %v395_v1, %v395_v1  ;;  %vm2424_vm7 = vcmask 39936  }
  0xb0   : > { %647 = vrot.lane.b32.xlu1 %v642_v24, %s1828_s26  ;;  %645 = vrot.lane.b32.xlu0 %v641_v25, %s1828_s26  ;;  %vm1049_vm9 = vcmask 269312   ;;  %vm1159_vm10 = vcmask 277504   ;;  %vm538_vm11 = vcmask 1031168  }
  0xb1   : > { %v402_v20 = vand.u32 %v396_v4, %v2096_v3  ;;  %v405_v21 = vand.u32 %v397_v5, %v2096_v3  ;;  %v1571_v4 = vld [vmem:[%s2418_s1 + $0x18] sm:$0x10] }
  0xb3   : > { %414 = vmatpush.bf16.msra.mxu2 %v402_v20  ;;  %428 = vmatpush.bf16.msra.mxu3 %v405_v21 }
  0xb4   : > { %753 = vrot.lane.b32.xlu2 %v750_v56, %s1829_s29 }
  0xb6   : > { %1501 = vmatmul.msk.bf16.vlgmr.msra.gmra.mxu2 %vm2424_vm7, %v1500_v26  ;;  %1502 = vmatmul.msk.bf16.vlgmr.msra.gmra.mxu3 %vm2424_vm7, %v1500_v26 }
  0xb8   : > { %757 = vrot.lane.b32.xlu1 %v752_v34, %s1829_s29  ;;  %755 = vrot.lane.b32.xlu0 %v751_v35, %s1829_s29 }
  0xbc   : > { %863 = vrot.lane.b32.xlu2 %v860_v58, %s1830_s30 }
  0xc0   : > { %867 = vrot.lane.b32.xlu1 %v862_v43, %s1830_s30  ;;  %865 = vrot.lane.b32.xlu0 %v861_v44, %s1830_s30 }
  0xc4   : > { %973 = vrot.lane.b32.xlu2 %v970_v60, %s1831_s5 }
  0xc8   : > { %977 = vrot.lane.b32.xlu1 %v972_v53, %s1831_s5  ;;  %975 = vrot.lane.b32.xlu0 %v971_v54, %s1831_s5  ;;  %v1570_v54 = vld [vmem:[%s2418_s1 + $0x10] sm:$0x10] }
  0xf1   : > { %v342_v2 = vpop.permute.xlu2 %341 }
  0xfb   : > { %v533_v44 = vpop.permute.xlu2 %532 }
 0x106   : > { %v644_v5 = vpop.permute.xlu2 %643 }
 0x10a   : > { %v340_v12 = vpop.permute.xlu1 %339  ;;  %v338_v13 = vpop.permute.xlu0 %337 }
 0x10b   : > { %v344_v18 = vsel %vm2422_vm8, %v338_v13, %v340_v12  ;;  %v345_v19 = vsel %vm2422_vm8, %v340_v12, %v342_v2 }
 0x10c   : > { %v355_v24 = vand.u32 %v2096_v3, %v344_v18  ;;  %v358_v25 = vand.u32 %v2096_v3, %v345_v19 }
 0x10e   : > { %367 = vmatpush.bf16.msra.mxu0 %v355_v24  ;;  %381 = vmatpush.bf16.msra.mxu1 %v358_v25  ;;  %v754_v21 = vpop.permute.xlu2 %753 }
 0x111   : > { %1495 = vmatmul.msk.bf16.vlgmr.msra.gmra.mxu0 %vm2424_vm7, %v1494_v27  ;;  %1496 = vmatmul.msk.bf16.vlgmr.msra.gmra.mxu1 %vm2424_vm7, %v1494_v27  ;;  %v1523_v27 = vld [vmem:[%s2418_s1 + $0x20] sm:$0xf] }
 0x112   : > { %v1047_v28 = vpop.permute.xlu0 %1046  ;;  %v1157_v29 = vpop.permute.xlu1 %1156 }
 0x113   : > { %v1048_v30 = vrot.slane %v1047_v28, 4  ;;  %v1158_v31 = vrot.slane %v1157_v29, 4 }
 0x115   : > { %v1050_v32 = vsel %vm1049_vm9, %v1048_v30, %v1047_v28  ;;  %v1058_v33 = vunpack.c.l.b16 %v1048_v30  ;;  %v1059_v34 = vunpack.c.h.b16 %v1048_v30  ;;  %v1160_v35 = vsel %vm1159_vm10, %v1158_v31, %v1157_v29  ;;  %v1572_v28 = vld [vmem:[%s2418_s1 + $0x20] sm:$0x10] }
 0x116   : > { %v1051_v36 = vunpack.c.l.b16 %v1050_v32  ;;  %v1052_v37 = vunpack.c.h.b16 %v1050_v32  ;;  %v1161_v38 = vunpack.c.l.b16 %v1160_v35  ;;  %v1162_v39 = vunpack.c.h.b16 %v1160_v35  ;;  %v864_v35 = vpop.permute.xlu2 %863 }
 0x117   : > { %v1168_v40 = vunpack.c.l.b16 %v1158_v31  ;;  %v1169_v41 = vunpack.c.h.b16 %v1158_v31  ;;  %vm1062_vm12 = vcmp.ne.s32.totalorder %v1058_v33, %v1954_v14  ;;  %vm1063_vm13 = vcmp.ne.s32.totalorder %v1059_v34, %v1956_v15  ;;  %v1531_v33 = vld [vmem:[%s2418_s1 + $0x28] sm:$0xf]  ;;  %v1573_v34 = vld [vmem:[%s2418_s1 + $0x28] sm:$0x10] }
 0x118   : > { %vm1055_vm14 = vcmp.ne.s32.totalorder %v1051_v36, %v1954_v14  ;;  %vm1056_vm15 = vcmp.ne.s32.totalorder %v1052_v37, %v1956_v15  ;;  %vm2125_vm0 = vcmp.ne.s32.totalorder %v1161_v38, %v1954_v14  ;;  %vm2130_vm1 = vcmp.ne.s32.totalorder %v1162_v39, %v1956_v15  ;;  %vm1064_vm9 = vmpackc.low %vm1063_vm13, %vm1062_vm12 }
 0x119   : > { %vm1057_vm10 = vmpackc.low %vm1056_vm15, %vm1055_vm14  ;;  %v1066_v45 = vsel %vm1064_vm9, %v1964_v22, 0  ;;  %vm1172_vm8 = vcmp.ne.s32.totalorder %v1168_v40, %v1954_v14  ;;  %vm1173_vm6 = vcmp.ne.s32.totalorder %v1169_v41, %v1956_v15  ;;  %v1507_v15 = vld [vmem:[%s2418_s1 + $0x10] sm:$0xf]  ;;  %vm759_vm13 = vcmask 908288  }
 0x11a   : > { %vm1167_vm7 = vmpackc.low %vm2130_vm1, %vm2125_vm0  ;;  %v1079_v46 = vunpack.c.l.b16 %v1066_v45  ;;  %v1065_v47 = vsel %vm1057_vm10, %v1967_v23, 0  ;;  %v537_v48 = vpop.permute.xlu1 %536  ;;  %v535_v49 = vpop.permute.xlu0 %534  ;;  %v1508_v61 = vor.u32 %v1570_v54, %v1507_v15  ;;  %v1524_v30 = vor.u32 %v1572_v28, %v1523_v27  ;;  %v1574_v45 = vld [vmem:[%s2418_s1 + $0x30] sm:$0x10] }
 0x11b   : > { %v1078_v50 = vunpack.c.h.b16 %v1065_v47  ;;  %v1077_v51 = vunpack.c.l.b16 %v1065_v47  ;;  %vm1174_vm12 = vmpackc.low %vm1173_vm6, %vm1172_vm8  ;;  %v539_v52 = vsel %vm538_vm11, %v533_v44, %v535_v49  ;;  %v540_v57 = vsel %vm538_vm11, %v535_v49, %v537_v48  ;;  %v1539_v44 = vld [vmem:[%s2418_s1 + $0x30] sm:$0xf] }
 0x11c   : > { %v1082_v53 = vpack.c.b16 %v1079_v46, %v1079_v46  ;;  %v1176_v14 = vsel %vm1174_vm12, %v1964_v22, 0  ;;  %v1175_v22 = vsel %vm1167_vm7, %v1967_v23, 0  ;;  %v545_v59 = vand.u32 %v539_v52, %v2096_v3  ;;  %v1515_v23 = vld [vmem:[%s2418_s1 + $0x18] sm:$0xf]  ;;  %v437_v52 = vld [vmem:[%s1961_s13 + $0xc] sm:$0x11] }
 0x11d   : > { %v1081_v55 = vpack.c.b16 %v1078_v50, %v1078_v50  ;;  %v1080_v56 = vpack.c.b16 %v1077_v51, %v1077_v51  ;;  %v1189_v58 = vunpack.c.l.b16 %v1176_v14  ;;  %v548_v60 = vand.u32 %v540_v57, %v2096_v3  ;;  %v435_v51 = vld [vmem:[%s1961_s13] sm:$0xcc] }
 0x11e   : > { %1087 = vrot.lane.b32.xlu1 %v1082_v53, %s2425_s9  ;;  %557 = vmatpush.bf16.msrb.mxu0 %v545_v59  ;;  %vm649_vm6 = vcmask 916480   ;;  %v1188_v62 = vunpack.c.h.b16 %v1175_v22  ;;  %v1187_v63 = vunpack.c.l.b16 %v1175_v22  ;;  %vm2461_vm8 = vcmask 39936   ;;  %v974_v41 = vpop.permute.xlu2 %973  ;;  %v436_v22 = vld [vmem:[%s1961_s13 + $0x8] sm:$0xc]  ;;  %v438_v59 = vld [vmem:[%s1961_s13 + $0x14] sm:$0x1] }
 0x11f   : > { %1085 = vrot.lane.b32.xlu0 %v1081_v55, %s2425_s9  ;;  %1083 = vrot.lane.b32.xlu2 %v1080_v56, %s2425_s9  ;;  %v1192_v0 = vpack.c.b16 %v1189_v58, %v1189_v58  ;;  %vm2462_vm7 = vmmov %vm2461_vm8  ;;  %v1516_v18 = vor.u32 %v1571_v4, %v1515_v23  ;;  %vm869_vm0 = vcmask 900096   ;;  %v1532_v40 = vor.u32 %v1573_v34, %v1531_v33  ;;  %v1302_v4 = vld [vmem:[%s2419_s2] sm:$0xff] }
 0x120   : > { %571 = vmatpush.bf16.msrb.mxu1 %v548_v60  ;;  %v1191_v13 = vpack.c.b16 %v1188_v62, %v1188_v62  ;;  %v1190_v16 = vpack.c.b16 %v1187_v63, %v1187_v63  ;;  %vm2463_vm14 = vmmov %vm2462_vm7  ;;  %vm979_vm12 = vcmask 785408   ;;  %v1540_v50 = vor.u32 %v1574_v45, %v1539_v44  ;;  %v1555_v34 = vld [vmem:[%s2418_s1 + $0x40] sm:$0xf] }
 0x121   : > { %1509 = vmatmul.msk.bf16.vlgmr.msrb.gmra.mxu0 %vm2461_vm8, %v1508_v61  ;;  %vm2464_vm15 = vmmov %vm2462_vm7  ;;  %v439_v53 = vunpack.c.l.bf16 %v435_v51  ;;  %v440_v14 = vunpack.c.h.bf16 %v435_v51  ;;  %v442_v15 = vunpack.c.l.bf16 %v437_v52  ;;  %v443_v54 = vunpack.c.h.bf16 %v437_v52  ;;  %v278_v51 = vld [vmem:[%s1961_s13 + $0xc] sm:$0x11] }
 0x122   : > { %v648_v1 = vpop.permute.xlu1 %647  ;;  %v646_v2 = vpop.permute.xlu0 %645  ;;  %vm2465_vm1 = vmmov %vm2462_vm7  ;;  %v441_v60 = vunpack.c.l.bf16 %v436_v22  ;;  %v444_v63 = vunpack.c.l.bf16 %v438_v59 }
 0x123   : > { %1510 = vmatmul.msk.bf16.vlgmr.msrb.gmra.mxu1 %vm2462_vm7, %v1508_v61  ;;  %v651_v6 = vsel %vm649_vm6, %v646_v2, %v648_v1  ;;  %v650_v11 = vsel %vm649_vm6, %v644_v5, %v646_v2  ;;  %vm2466_vm9 = vmmov %vm2465_vm1  ;;  %v451_v55 = vrot.slane %v439_v53, 5  ;;  %v452_v56 = vrot.slane %v442_v15, 5 }
 0x124   : > { %v659_v12 = vand.u32 %v651_v6, %v2096_v3  ;;  %v656_v17 = vand.u32 %v650_v11, %v2096_v3  ;;  %vm2467_vm10 = vmmov %vm2465_vm1  ;;  %v454_v57 = vrot.slane %v440_v14, 5  ;;  %v455_v58 = vrot.slane %v443_v54, 5 }
 0x125   : > { %vm2468_vm8 = vmmov %vm2465_vm1  ;;  %v457_v1 = vrot.slane %v441_v60, 5  ;;  %v458_v2 = vrot.slane %v444_v63, 5 }
 0x126   : > { %1197 = vrot.lane.b32.xlu1 %v1192_v0, %s1834_s22  ;;  %682 = vmatpush.bf16.msrb.mxu3 %v659_v12  ;;  %vm2469_vm7 = vmmov %vm2465_vm1 }
 0x127   : > { %1195 = vrot.lane.b32.xlu0 %v1191_v13, %s1834_s22  ;;  %1193 = vrot.lane.b32.xlu2 %v1190_v16, %s1834_s22  ;;  %v1547_v16 = vld [vmem:[%s2418_s1 + $0x38] sm:$0xf] }
 0x128   : > { %668 = vmatpush.bf16.msrb.mxu2 %v656_v17  ;;  %v1575_v17 = vld [vmem:[%s2418_s1 + $0x38] sm:$0x10] }
 0x129   : > { %1518 = vmatmul.msk.bf16.vlgmr.msrb.gmra.mxu3 %vm2463_vm14, %v1516_v18  ;;  %vm2470_vm14 = vmmov %vm2465_vm1 }
 0x12a   : > { %v758_v19 = vpop.permute.xlu1 %757  ;;  %v756_v20 = vpop.permute.xlu0 %755 }
 0x12b   : > { %1517 = vmatmul.msk.bf16.vlgmr.msrb.gmra.mxu2 %vm2464_vm15, %v1516_v18  ;;  %v761_v24 = vsel %vm759_vm13, %v756_v20, %v758_v19  ;;  %v760_v25 = vsel %vm759_vm13, %v754_v21, %v756_v20  ;;  %vm2471_vm15 = vcmask 1042432  }
 0x12c   : > { %v769_v26 = vand.u32 %v761_v24, %v2096_v3  ;;  %v766_v29 = vand.u32 %v760_v25, %v2096_v3  ;;  %v453_v61 = vsel %vm2471_vm15, %v451_v55, %v452_v56  ;;  %v281_v55 = vunpack.c.l.bf16 %v278_v51 }
 0x12e   : > { %792 = vmatpush.bf16.msra.mxu1 %v769_v26  ;;  %778 = vmatpush.bf16.msra.mxu0 %v766_v29  ;;  %v1548_v26 = vor.u32 %v1575_v17, %v1547_v16  ;;  %v285_v63 = vsel %vm1922_vm3, %v281_v55, -inf }
 0x131   : > { %1525 = vmatmul.msk.bf16.vlgmr.msra.gmra.mxu0 %vm2465_vm1, %v1524_v30  ;;  %vm2472_vm1 = vmmov %vm2471_vm15 }
 0x132   : > { %v868_v31 = vpop.permute.xlu1 %867  ;;  %v866_v32 = vpop.permute.xlu0 %865  ;;  %v456_v62 = vsel %vm2472_vm1, %v454_v57, %v455_v58  ;;  %vm2476_vm15 = vmmov %vm2469_vm7  ;;  %v282_v58 = vunpack.c.h.bf16 %v278_v51 }
 0x133   : > { %1526 = vmatmul.msk.bf16.vlgmr.msra.gmra.mxu1 %vm2466_vm9, %v1524_v30  ;;  %v871_v36 = vsel %vm869_vm0, %v866_v32, %v868_v31  ;;  %v870_v37 = vsel %vm869_vm0, %v864_v35, %v866_v32  ;;  %v1664_v0 = vpack.i.bf16 %v456_v62, %v453_v61  ;;  %vm2473_vm9 = vmmov %vm2472_vm1  ;;  %v1576_v35 = vld [vmem:[%s2418_s1 + $0x40] sm:$0x10] }
 0x134   : > { %v879_v38 = vand.u32 %v871_v36, %v2096_v3  ;;  %v876_v39 = vand.u32 %v870_v37, %v2096_v3  ;;  %v459_v23 = vsel %vm2473_vm9, %v457_v1, %v458_v2  ;;  %vm2477_vm1 = vmmov %vm2469_vm7  ;;  %vm2478_vm9 = vcmask 1039360  }
 0x135   : > { %1665 = vrot.lane.b32.xlu1 %v1664_v0, %s1827_s24  ;;  %464 = vrot.lane.b32.xlu0 %v459_v23, %s1824_s14 }
 0x136   : > { %902 = vmatpush.bf16.msra.mxu3 %v879_v38  ;;  %888 = vmatpush.bf16.msra.mxu2 %v876_v39 }
 0x137   : > { %1660 = vrot.lane.b32.xlu2 %v1664_v0, %s1824_s14 }
 0x139   : > { %1534 = vmatmul.msk.bf16.vlgmr.msra.gmra.mxu3 %vm2467_vm10, %v1532_v40  ;;  %vm1089_vm10 = vcmask 777216   ;;  %v416_v24 = vpop.f32.mrf.mxu2  ;;  %v430_v25 = vpop.f32.mrf.mxu3 }
 0x13a   : > { %v978_v42 = vpop.permute.xlu1 %977  ;;  %v976_v43 = vpop.permute.xlu0 %975 }
 0x13b   : > { %1533 = vmatmul.msk.bf16.vlgmr.msra.gmra.mxu2 %vm2468_vm8, %v1532_v40  ;;  %v980_v46 = vsel %vm979_vm12, %v974_v41, %v976_v43  ;;  %v981_v47 = vsel %vm979_vm12, %v976_v43, %v978_v42  ;;  %vm1199_vm8 = vcmask 769024   ;;  %v1556_v40 = vor.u32 %v1576_v35, %v1555_v34 }
 0x13c   : > { %v986_v48 = vand.u32 %v980_v46, %v2096_v3  ;;  %v989_v49 = vand.u32 %v981_v47, %v2096_v3 }
 0x13d   : > { %697 = vrot.lane.b32.xlu1 %v459_v23, %s1828_s26  ;;  %1670 = vrot.lane.b32.xlu0 %v1664_v0, %s1828_s26 }
 0x13e   : > { %998 = vmatpush.bf16.msrb.mxu0 %v986_v48  ;;  %1012 = vmatpush.bf16.msrb.mxu1 %v989_v49 }
 0x13f   : > { %586 = vrot.lane.b32.xlu2 %v459_v23, %s1827_s24 }
 0x141   : > { %1541 = vmatmul.msk.bf16.vlgmr.msrb.gmra.mxu0 %vm2469_vm7, %v1540_v50 }
 0x143   : > { %1542 = vmatmul.msk.bf16.vlgmr.msrb.gmra.mxu1 %vm2470_vm14, %v1540_v50  ;;  %vm2475_vm14 = vmmov %vm2469_vm7  ;;  %v277_v50 = vld [vmem:[%s1961_s13] sm:$0xcc]  ;;  %s2336_s13 = sand.u32 1, %s1798_s16  }
 0x144   : > { %v279_v15 = vunpack.c.l.bf16 %v277_v50  ;;  %v280_v54 = vunpack.c.h.bf16 %v277_v50  ;;  %s1487_s6 = sshll.u32 %s2336_s13, 3  ;;  %s1340_s24 = scalar_lea.sflag [#allocation5], %s2336_s13 }
 0x145   : > { %1680 = vrot.lane.b32.xlu1 %v1664_v0, %s1830_s30  ;;  %807 = vrot.lane.b32.xlu0 %v459_v23, %s1829_s29  ;;  %s222_s11 = scalar_lea.vmem [#allocation4], %s1487_s6 }
 0x146   : > { %v283_v61 = vsel %vm1922_vm3, %v279_v15, -inf  ;;  %v284_v62 = vsel %vm1930_vm5, %v280_v54, -inf  ;;  %s1372_s26 = sshll.u32 %s222_s11, 4  ;;  %s1373_s26 = int_to_ptr.vmem [resolvable:$true] %s1372_s26 }
 0x147   : > { %1675 = vrot.lane.b32.xlu2 %v1664_v0, %s1829_s29 }
 0x14d   : > { %1027 = vrot.lane.b32.xlu1 %v459_v23, %s1831_s5  ;;  %1685 = vrot.lane.b32.xlu0 %v1664_v0, %s1831_s5 }
 0x14f   : > { %917 = vrot.lane.b32.xlu2 %v459_v23, %s1830_s30 }
 0x155   : > { %1695 = vrot.lane.b32.xlu1 %v1664_v0, %s1834_s22  ;;  %1137 = vrot.lane.b32.xlu0 %v459_v23, %s2474_s10 }
 0x157   : > { %1690 = vrot.lane.b32.xlu2 %v1664_v0, %s2474_s10 }
 0x15d   : > { %1305 = vperm.xlu0 %1699, %v1302_v4  }
 0x15f   : > { %1247 = vrot.lane.b32.xlu2 %v459_v23, %s1834_s22  ;;  %s1578_s22 = sshll.u32 %s1806_s18, 3 }
 0x160   : > { %s1370_s10 = scalar_lea.hbm %s2421_s4, %s1578_s22 }
 0x161   : > { %s1374_s14 = sshll.u32 %s1370_s10, 4  ;;  %s1375_s14 = int_to_ptr.hbm [resolvable:$true] %s1374_s14 }
 0x162   : > { %s1718_s5 = sshra.s32 %s1375_s14, 4  ;;  %s1719_s5 = int_to_ptr.hbm [resolvable:$true] %s1718_s5 }
 0x163   : > { %s1720_s12 = scalar_lea.hbm %s1719_s5, 8  ;;  %p1725_p1 = scmp.lt.s32.totalorder %s1719_s5, %s2421_s4 }
 0x164   : > { %p1721_p12 = scmp.ne.s32.totalorder %s1719_s5, %s1720_s12  ;;  %p1726_p2 = scmp.lt.s32.totalorder %s1724_s21, %s1720_s12 }
 0x166   : > { %p1722_p13 = pnand %p1721_p12, %p1900_p4  ;;  %p1727_p3 = por %p1726_p2, %p1725_p1 }
 0x168   : > { %p1723_p0 = pneg %p1722_p13 }
 0x16a   : > { %p1728_p5 = pnand %p1727_p3, %p1723_p0 }
 0x179   : > { %v1084_v11 = vpop.permute.xlu2 %1083 }
 0x181   : > { %v1194_v32 = vpop.permute.xlu2 %1193 }
 0x18e   : > { %v369_v5 = vpop.f32.mrf.mxu0  ;;  %v383_v6 = vpop.f32.mrf.mxu1 }
 0x18f   : > { %v417_v27 = vadd.f32 %v416_v24, %v369_v5  ;;  %v431_v28 = vadd.f32 %v430_v25, %v383_v6 }
 0x190   : > { %v1088_v12 = vpop.permute.xlu1 %1087 }
 0x191   : > { %v1086_v13 = vpop.permute.xlu0 %1085  ;;  %v1661_v45 = vpop.permute.xlu2 %1660 }
 0x192   : > { %v1090_v18 = vsel %vm1089_vm10, %v1084_v11, %v1086_v13  ;;  %v1091_v19 = vsel %vm1089_vm10, %v1086_v13, %v1088_v12  ;;  %v1662_v47 = vunpack.i.l.bf16 %v1661_v45  ;;  %v286_v11 = vsel %vm1930_vm5, %v282_v58, -inf }
 0x193   : > { %v1096_v20 = vand.u32 %v1090_v18, %v2096_v3  ;;  %v1099_v21 = vand.u32 %v1091_v19, %v2096_v3 }
 0x195   : > { %1108 = vmatpush.bf16.msrb.mxu2 %v1096_v20  ;;  %1122 = vmatpush.bf16.msrb.mxu3 %v1099_v21 }
 0x196   : > { %v2250_v29 = vpop.f32.mrf.mxu0  ;;  %v2252_v30 = vpop.f32.mrf.mxu1 }
 0x198   : > { %v1198_v31 = vpop.permute.xlu1 %1197  ;;  %1549 = vmatmul.msk.bf16.vlgmr.msrb.gmra.mxu2 %vm2469_vm7, %v1548_v26  ;;  %1550 = vmatmul.msk.bf16.vlgmr.msrb.gmra.mxu3 %vm2475_vm14, %v1548_v26  ;;  %vm2479_vm7 = vmmov %vm2478_vm9 }
 0x199   : > { %v1196_v33 = vpop.permute.xlu0 %1195  ;;  %v587_v49 = vpop.permute.xlu2 %586 }
 0x19a   : > { %v1200_v36 = vsel %vm1199_vm8, %v1194_v32, %v1196_v33  ;;  %v1201_v37 = vsel %vm1199_vm8, %v1196_v33, %v1198_v31 }
 0x19b   : > { %v1206_v38 = vand.u32 %v1200_v36, %v2096_v3  ;;  %v1209_v39 = vand.u32 %v1201_v37, %v2096_v3  ;;  %v1663_v3 = vunpack.i.h.bf16 %v1661_v45 }
 0x19d   : > { %1218 = vmatpush.bf16.msra.mxu0 %v1206_v38  ;;  %1232 = vmatpush.bf16.msra.mxu1 %v1209_v39  ;;  %v467_v14 = vsel %vm2478_vm9, %v1662_v47, %v1663_v3 }
 0x19e   : > { %v559_v41 = vpop.f32.mrf.mxu0  ;;  %v475_v60 = vrot.slane %v467_v14, 3 }
 0x19f   : > { %v2269_v43 = vadd.f32 %v559_v41, %v417_v27 }
 0x1a0   : > { %1557 = vmatmul.msk.bf16.vlgmr.msra.gmra.mxu0 %vm2476_vm15, %v1556_v40  ;;  %1558 = vmatmul.msk.bf16.vlgmr.msra.gmra.mxu1 %vm2477_vm1, %v1556_v40  ;;  %v573_v42 = vpop.f32.mrf.mxu1  ;;  %v479_v12 = vmax.f32 %v283_v61, %v475_v60  ;;  %v481_v18 = vmax.f32 %v285_v63, %v475_v60 }
 0x1a1   : > { %v2271_v44 = vadd.f32 %v573_v42, %v431_v28  ;;  %v1676_v2 = vpop.permute.xlu2 %1675 }
 0x1a2   : > { %v1678_v25 = vunpack.i.h.bf16 %v1676_v2  ;;  %v1677_v26 = vunpack.i.l.bf16 %v1676_v2 }
 0x1a4   : > { %v810_v41 = vsel %vm759_vm13, %v1677_v26, %v1678_v25 }
 0x1a5   : > { %v818_v50 = vrot.slane %v810_v41, 3 }
 0x1a6   : > { %v2305_v51 = vpop.f32.mrf.mxu0 }
 0x1a7   : > { %v1666_v46 = vpop.permute.xlu1 %1665  ;;  %v465_v48 = vpop.permute.xlu0 %464 }
 0x1a8   : > { %v1668_v52 = vunpack.i.h.bf16 %v1666_v46  ;;  %v1667_v53 = vunpack.i.l.bf16 %v1666_v46  ;;  %v468_v56 = vsel %vm2479_vm7, %v1663_v3, %v465_v48  ;;  %v2300_v46 = vpop.f32.mrf.mxu2  ;;  %v2302_v3 = vpop.f32.mrf.mxu3 }
 0x1a9   : > { %v476_v0 = vrot.slane %v468_v56, 3  ;;  %v918_v37 = vpop.permute.xlu2 %917 }
 0x1aa   : > { %v589_v57 = vsel %vm538_vm11, %v1667_v53, %v1668_v52  ;;  %v590_v22 = vsel %vm538_vm11, %v1668_v52, %v587_v49  ;;  %v2307_v52 = vpop.f32.mrf.mxu1 }
 0x1ab   : > { %v593_v23 = vsel %vm1918_vm2, %v589_v57, -inf  ;;  %v594_v4 = vsel %vm1926_vm4, %v590_v22, -inf  ;;  %v480_v19 = vmax.f32 %v284_v62, %v476_v0  ;;  %v482_v21 = vmax.f32 %v286_v11, %v476_v0 }
 0x1ac   : > { %v597_v17 = vrot.slane %v593_v23, 3  ;;  %v598_v20 = vrot.slane %v594_v4, 3 }
 0x1ae   : > { %v601_v33 = vmax.f32 %v479_v12, %v597_v17  ;;  %v603_v34 = vmax.f32 %v481_v18, %v597_v17  ;;  %v602_v38 = vmax.f32 %v480_v19, %v598_v20  ;;  %v604_v39 = vmax.f32 %v482_v21, %v598_v20  ;;  %v2323_v21 = vpop.f32.mrf.mxu0 }
 0x1af   : > { %v698_v59 = vpop.permute.xlu1 %697  ;;  %v1671_v1 = vpop.permute.xlu0 %1670 }
 0x1b0   : > { %v1673_v5 = vunpack.i.h.bf16 %v1671_v1  ;;  %v1672_v6 = vunpack.i.l.bf16 %v1671_v1  ;;  %v2313_v4 = vpop.f32.mrf.mxu2 }
 0x1b1   : > { %v1691_v60 = vpop.permute.xlu2 %1690 }
 0x1b2   : > { %v701_v13 = vsel %vm649_vm6, %v1673_v5, %v698_v59  ;;  %v700_v16 = vsel %vm649_vm6, %v1672_v6, %v1673_v5  ;;  %v2315_v5 = vpop.f32.mrf.mxu3  ;;  %v1693_v18 = vunpack.i.h.bf16 %v1691_v60  ;;  %v1692_v19 = vunpack.i.l.bf16 %v1691_v60 }
 0x1b3   : > { %v704_v24 = vsel %vm1922_vm3, %v700_v16, -inf  ;;  %v705_v27 = vsel %vm1930_vm5, %v701_v13, -inf }
 0x1b4   : > { %v708_v35 = vrot.slane %v704_v24, 3  ;;  %v709_v40 = vrot.slane %v705_v27, 3  ;;  %v2325_v24 = vpop.f32.mrf.mxu1 }
 0x1b6   : > { %v712_v48 = vmax.f32 %v601_v33, %v708_v35  ;;  %v714_v49 = vmax.f32 %v603_v34, %v708_v35  ;;  %v713_v14 = vmax.f32 %v602_v38, %v709_v40  ;;  %v715_v15 = vmax.f32 %v604_v39, %v709_v40 }
 0x1b7   : > { %v1681_v28 = vpop.permute.xlu1 %1680  ;;  %v808_v36 = vpop.permute.xlu0 %807 }
 0x1b8   : > { %v1683_v31 = vunpack.i.h.bf16 %v1681_v28  ;;  %v1682_v32 = vunpack.i.l.bf16 %v1681_v28  ;;  %v811_v45 = vsel %vm759_vm13, %v1678_v25, %v808_v36  ;;  %v822_v57 = vmax.f32 %v712_v48, %v818_v50 }
 0x1b9   : > { %v819_v54 = vrot.slane %v811_v45, 3  ;;  %v824_v58 = vmax.f32 %v714_v49, %v818_v50  ;;  %v1248_v35 = vpop.permute.xlu2 %1247 }
 0x1ba   : > { %v920_v42 = vsel %vm869_vm0, %v1682_v32, %v1683_v31  ;;  %v921_v47 = vsel %vm869_vm0, %v1683_v31, %v918_v37  ;;  %v1140_v31 = vsel %vm1089_vm10, %v1692_v19, %v1693_v18 }
 0x1bb   : > { %v924_v53 = vsel %vm1918_vm2, %v920_v42, -inf  ;;  %v925_v55 = vsel %vm1926_vm4, %v921_v47, -inf  ;;  %v823_v61 = vmax.f32 %v713_v14, %v819_v54  ;;  %v825_v62 = vmax.f32 %v715_v15, %v819_v54  ;;  %v672_v14 = vpop.f32.mrf.mxu2  ;;  %v686_v15 = vpop.f32.mrf.mxu3 }
 0x1bc   : > { %v928_v22 = vrot.slane %v924_v53, 3  ;;  %v929_v63 = vrot.slane %v925_v55, 3  ;;  %v1148_v34 = vrot.slane %v1140_v31, 3  ;;  %v782_v55 = vpop.f32.mrf.mxu0 }
 0x1be   : > { %v932_v2 = vmax.f32 %v822_v57, %v928_v22  ;;  %v934_v23 = vmax.f32 %v824_v58, %v928_v22  ;;  %v933_v6 = vmax.f32 %v823_v61, %v929_v63  ;;  %v935_v11 = vmax.f32 %v825_v62, %v929_v63 }
 0x1bf   : > { %v1028_v56 = vpop.permute.xlu1 %1027  ;;  %v1686_v59 = vpop.permute.xlu0 %1685 }
 0x1c0   : > { %v1688_v0 = vunpack.i.h.bf16 %v1686_v59  ;;  %v1687_v1 = vunpack.i.l.bf16 %v1686_v59 }
 0x1c2   : > { %v1031_v12 = vsel %vm979_vm12, %v1688_v0, %v1028_v56  ;;  %v1030_v13 = vsel %vm979_vm12, %v1687_v1, %v1688_v0  ;;  %v796_v56 = vpop.f32.mrf.mxu1  ;;  %v419_v1 = vadd.f32 %v2300_v46, %v2250_v29 }
 0x1c3   : > { %v1035_v16 = vsel %vm1930_vm5, %v1031_v12, -inf  ;;  %v1034_v17 = vsel %vm1922_vm3, %v1030_v13, -inf  ;;  %v2343_v9 = vpop.f32.mrf.mxu2  ;;  %v2345_v22 = vpop.f32.mrf.mxu3  ;;  %vm2480_vm3 = vcmask 1042432  }
 0x1c4   : > { %v1039_v25 = vrot.slane %v1035_v16, 3  ;;  %v1038_v26 = vrot.slane %v1034_v17, 3  ;;  %v2347_v60 = vpop.f32.mrf.mxu0 }
 0x1c6   : > { %v1042_v33 = vmax.f32 %v932_v2, %v1038_v26  ;;  %v1044_v10 = vmax.f32 %v934_v23, %v1038_v26  ;;  %v1043_v37 = vmax.f32 %v933_v6, %v1039_v25  ;;  %v1045_v38 = vmax.f32 %v935_v11, %v1039_v25 }
 0x1c7   : > { %v1696_v20 = vpop.permute.xlu1 %1695  ;;  %v1138_v32 = vpop.permute.xlu0 %1137  ;;  %v433_v2 = vadd.f32 %v2302_v3, %v2252_v30 }
 0x1c8   : > { %v1698_v27 = vunpack.i.h.bf16 %v1696_v20  ;;  %v1697_v28 = vunpack.i.l.bf16 %v1696_v20  ;;  %v1141_v39 = vsel %vm1089_vm10, %v1693_v18, %v1138_v32  ;;  %v1152_v40 = vmax.f32 %v1042_v33, %v1148_v34 }
 0x1c9   : > { %v1154_v41 = vmax.f32 %v1044_v10, %v1148_v34  ;;  %v1149_v45 = vrot.slane %v1141_v39, 3 }
 0x1ca   : > { %v1250_v8 = vsel %vm1199_vm8, %v1697_v28, %v1698_v27  ;;  %v1251_v47 = vsel %vm1199_vm8, %v1698_v27, %v1248_v35  ;;  %v2349_v61 = vpop.f32.mrf.mxu1 }
 0x1cb   : > { %v1254_v36 = vsel %vm1918_vm2, %v1250_v8, -inf  ;;  %v1153_v50 = vmax.f32 %v1043_v37, %v1149_v45  ;;  %v1155_v53 = vmax.f32 %v1045_v38, %v1149_v45  ;;  %v1255_v7 = vsel %vm1926_vm4, %v1251_v47, -inf }
 0x1cc   : > { %v1258_v42 = vrot.slane %v1254_v36, 3  ;;  %v1259_v54 = vrot.slane %v1255_v7, 3  ;;  %vm1326_vm2 = vcmask 1046532  }
 0x1cd   : > { %vm1327_vm4 = vmor %vm2480_vm3, %vm1326_vm2 }
 0x1ce   : > { %v1262_v48 = vmax.f32 %v1152_v40, %v1258_v42  ;;  %v1264_v49 = vmax.f32 %v1154_v41, %v1258_v42  ;;  %v1263_v57 = vmax.f32 %v1153_v50, %v1259_v54  ;;  %v1265_v58 = vmax.f32 %v1155_v53, %v1259_v54 }
 0x1d0   : > { %1318 = vst.sshfl [vmem:[#allocation1] sm:$0xff pattern:$0x75316420] %v1262_v48 }
 0x1d1   : > { %1320 = vst.sshfl [vmem:[#allocation1 + $0x10] sm:$0xff pattern:$0x75316420] %v1264_v49 }
 0x1d2   : > { %1319 = vst.sshfl [vmem:[#allocation1 + $0x8] sm:$0xff pattern:$0x75316420] %v1263_v57 }
 0x1d3   : > { %1321 = vst.sshfl [vmem:[#allocation1 + $0x18] sm:$0xff pattern:$0x75316420] %v1265_v58 }
 0x1d9   : > { %v1323_v59 = vld [vmem:[#allocation1 + $0x1] ss:$2 sm:$0xff] }
 0x1da   : > { %v1325_v62 = vld [vmem:[#allocation1 + $0x10] ss:$2 sm:$0xff]  ;;  %v1559_v63 = vrot.slane %v1323_v59, 9 }
 0x1db   : > { %v1330_v0 = vrot.slane %v1325_v62, 5 }
 0x1dd   : > { %v1331_v23 = vsel %vm1327_vm4, %v1559_v63, %v1330_v0 }
 0x1de   : > { %1333 = vst [vmem:[%s222_s11] sm:$0xff] %v1331_v23 }
 0x1df   : > { %1731 = shalt.err (!%p1728_p5)
}
 0x1e0   : > { %1581 = dma.vmem_to_hbm [thread:$0]  (%p1900_p4), %s1373_s26, 128, %s1375_s14, %s1340_s24   ;;  %v580_v29 = vadd.f32 %v2305_v51, %v419_v1  ;;  %v581_v30 = vadd.f32 %v2307_v52, %v433_v2  ;;  %v892_v46 = vpop.f32.mrf.mxu2  ;;  %v906_v3 = vpop.f32.mrf.mxu3  ;;  %v689_v36 = vadd.f32 %v2313_v4, %v2269_v43  ;;  %v690_v39 = vadd.f32 %v2315_v5, %v2271_v44 }
 0x1e1   : > { %v1002_v6 = vpop.f32.mrf.mxu0  ;;  %v1016_v11 = vpop.f32.mrf.mxu1  ;;  %s1486_s6 = sshll.u32 %s2336_s13, 4  ;;  %s1577_s7 = sshll.u32 %s1806_s18, 4 }
 0x1e2   : > { %v691_v12 = vadd.f32 %v672_v14, %v580_v29  ;;  %v692_v13 = vadd.f32 %v686_v15, %v581_v30  ;;  %v799_v40 = vadd.f32 %v2323_v21, %v689_v36  ;;  %v800_v41 = vadd.f32 %v2325_v24, %v690_v39  ;;  %v1306_v1 = vpop.permute.xlu0 %1305  ;;  %s1353_s11 = scalar_lea.hbm %s2420_s3, %s1577_s7  ;;  %s215_s26 = scalar_lea.vmem [#allocation2], %s1486_s6 }
 0x1e3   : > { %s1355_s18 = sshll.u32 %s215_s26, 4  ;;  %s1357_s14 = sshll.u32 %s1353_s11, 4  ;;  %s1356_s18 = int_to_ptr.vmem [resolvable:$true] %s1355_s18  ;;  %s1358_s14 = int_to_ptr.hbm [resolvable:$true] %s1357_s14 }
 0x1e4   : > { %v801_v16 = vadd.f32 %v782_v55, %v691_v12  ;;  %v802_v17 = vadd.f32 %v796_v56, %v692_v13  ;;  %v909_v45 = vadd.f32 %v2343_v9, %v799_v40  ;;  %v910_v49 = vadd.f32 %v2345_v22, %v800_v41  ;;  %s1335_s24 = scalar_lea.sflag [#allocation3], %s2336_s13  ;;  %s1746_s5 = sshra.s32 %s1358_s14, 4  ;;  %s1747_s5 = int_to_ptr.hbm [resolvable:$true] %s1746_s5 }
 0x1e5   : > { %s1748_s12 = scalar_lea.hbm %s1747_s5, 16  ;;  %s1752_s21 = scalar_lea.hbm %s2420_s3, 32 }
 0x1e6   : > { %v911_v26 = vadd.f32 %v892_v46, %v801_v16  ;;  %v912_v27 = vadd.f32 %v906_v3, %v802_v17  ;;  %v1019_v4 = vadd.f32 %v2347_v60, %v909_v45  ;;  %v1020_v24 = vadd.f32 %v2349_v61, %v910_v49  ;;  %p1749_p6 = scmp.ne.s32.totalorder %s1747_s5, %s1748_s12  ;;  %p1753_p10 = scmp.lt.s32.totalorder %s1747_s5, %s2420_s3 }
 0x1e7   : > { %p1754_p11 = scmp.lt.s32.totalorder %s1752_s21, %s1748_s12 }
 0x1e8   : > { %v1021_v28 = vadd.f32 %v1002_v6, %v911_v26  ;;  %v1022_v31 = vadd.f32 %v1016_v11, %v912_v27  ;;  %p1750_p7 = pnand %p1749_p6, %p1900_p4 }
 0x1e9   : > { %p1755_p12 = por %p1754_p11, %p1753_p10 }
 0x1ea   : > { %p1751_p9 = pneg %p1750_p7 }
 0x1ec   : > { %p1756_p13 = pnand %p1755_p12, %p1751_p9 }
 0x21b   : > { %v1110_v18 = vpop.f32.mrf.mxu2  ;;  %v1124_v19 = vpop.f32.mrf.mxu3 }
 0x21c   : > { %v1129_v54 = vadd.f32 %v1110_v18, %v1019_v4  ;;  %v1130_v56 = vadd.f32 %v1124_v19, %v1020_v24 }
 0x21d   : > { %v1220_v20 = vpop.f32.mrf.mxu0  ;;  %v1234_v25 = vpop.f32.mrf.mxu1 }
 0x21e   : > { %v1239_v61 = vadd.f32 %v1220_v20, %v1129_v54  ;;  %v1240_v0 = vadd.f32 %v1234_v25, %v1130_v56 }
 0x223   : > { %v1112_v32 = vpop.f32.mrf.mxu2  ;;  %v1126_v51 = vpop.f32.mrf.mxu3 }
 0x224   : > { %v1131_v33 = vadd.f32 %v1112_v32, %v1021_v28  ;;  %v1132_v52 = vadd.f32 %v1126_v51, %v1022_v31 }
 0x225   : > { %v1222_v10 = vpop.f32.mrf.mxu0  ;;  %v1236_v34 = vpop.f32.mrf.mxu1 }
 0x226   : > { %v1241_v8 = vadd.f32 %v1222_v10, %v1131_v33  ;;  %v1242_v35 = vadd.f32 %v1236_v34, %v1132_v52 }
 0x228   : > { %v1266_v37 = vadd.f32 1e-08, %v1241_v8  ;;  %v1267_v38 = vadd.f32 1e-08, %v1242_v35 }
 0x22a   : > { %1700 = vrcp.f32 %v1266_v37  ;;  %v1279_v7 = vand.u32 2147483648, %v1266_v37  ;;  %v1277_v5 = vand.u32 2147483647, %v1266_v37  ;;  %v1294_v21 = vand.u32 2147483648, %v1267_v38 }
 0x22b   : > { %1702 = vrcp.f32 %v1267_v38  ;;  %v1292_v15 = vand.u32 2147483647, %v1267_v38  ;;  %vm1273_vm6 = vweird.f32 %v1266_v37  ;;  %vm1288_vm0 = vweird.f32 %v1267_v38 }
 0x22c   : > { %v1280_v57 = vor.u32 1.1754944e-38, %v1279_v7  ;;  %vm1278_vm12 = vcmp.eq.f32.partialorder %v1277_v5, 8.507059e+37  ;;  %v1295_v22 = vor.u32 1.1754944e-38, %v1294_v21 }
 0x22d   : > { %vm1293_vm8 = vcmp.eq.f32.partialorder %v1292_v15, 8.507059e+37 }
 0x230   : > { %v1701_v42 = vpop.eup %1700 }
 0x231   : > { %v1703_v47 = vpop.eup %1702  ;;  %v1269_v48 = vmul.f32 %v1701_v42, %v1266_v37  ;;  %vm1274_vm5 = vweird.f32 %v1701_v42 }
 0x232   : > { %v1284_v50 = vmul.f32 %v1703_v47, %v1267_v38  ;;  %vm1289_vm11 = vweird.f32 %v1703_v47  ;;  %vm1275_vm13 = vmor %vm1273_vm6, %vm1274_vm5 }
 0x233   : > { %v1270_v43 = vsub.f32 1.0, %v1269_v48  ;;  %vm1290_vm10 = vmor %vm1288_vm0, %vm1289_vm11 }
 0x234   : > { %v1285_v53 = vsub.f32 1.0, %v1284_v50 }
 0x235   : > { %v1271_v44 = vmul.f32 %v1701_v42, %v1270_v43 }
 0x236   : > { %v1286_v14 = vmul.f32 %v1703_v47, %v1285_v53 }
 0x237   : > { %v1272_v55 = vadd.f32 %v1701_v42, %v1271_v44 }
 0x238   : > { %v1287_v58 = vadd.f32 %v1703_v47, %v1286_v14 }
 0x239   : > { %v1276_v9 = vsel %vm1275_vm13, %v1701_v42, %v1272_v55 }
 0x23a   : > { %v1281_v59 = vsel %vm1278_vm12, %v1280_v57, %v1276_v9  ;;  %v1291_v60 = vsel %vm1290_vm10, %v1703_v47, %v1287_v58 }
 0x23b   : > { %v1296_v62 = vsel %vm1293_vm8, %v1295_v22, %v1291_v60  ;;  %v1298_v63 = vperm.slane %v1281_v59, 0 }
 0x23c   : > { %v1299_v2 = vperm.slane %v1296_v62, 0 }
 0x23d   : > { %v1300_v23 = vmul.f32 %v1298_v63, %v1239_v61 }
 0x23e   : > { %v1301_v29 = vmul.f32 %v1299_v2, %v1240_v0 }
 0x23f   : > { %v1308_v30 = vadd.f32 %v1306_v1, %v1300_v23 }
 0x240   : > { %v1309_v46 = vadd.f32 %v1306_v1, %v1301_v29 }
 0x241   : > { %v1310_v3 = vmax.f32 %v1308_v30, 0.0 }
 0x242   : > { %v1311_v6 = vmax.f32 %v1309_v46, 0.0 }
 0x243   : > { %1312 = vst [vmem:[%s215_s26] sm:$0xff] %v1310_v3 }
 0x244   : > { %1313 = vst [vmem:[%s215_s26 + $0x8] sm:$0xff] %v1311_v6 }
 0x245   : > { %1759 = shalt.err (!%p1756_p13)
}
 0x246   : > { %1580 = dma.vmem_to_hbm [thread:$0]  (%p1900_p4), %s1356_s18, 256, %s1358_s14, %s1335_s24  }
 0x247 PF: > { %p1591_p0 = scmp.ge.s32.totalorder %s1814_s20, 2  ;;  %s1386_s13 = sand.u32 1, %s1794_s15  }
 0x248   : > { %s1387_s6 = scalar_lea.sflag [#allocation3], %s1386_s13 }
 0x249   : > { %p1585_p1 = pnand %p1591_p0, %p1907_p8 }
 0x24b   : > { %p1586_p2 = pneg %p1585_p1 }
 0x24d   : > { %1785 = dma.done.wait (%p1586_p2), %s1387_s6, 256  }
 0x24e   : > { %1787 = vsyncadd (%p1586_p2), %s1387_s6, 4294967040  ;;  %s1397_s7 = scalar_lea.sflag [#allocation5], %s1386_s13 }
 0x24f   : > { %1789 = dma.done.wait (%p1586_p2), %s1397_s7, 128  }
 0x250   : > { %1791 = vsyncadd (%p1586_p2), %s1397_s7, 4294967168  ;;  %s21_s20 = sadd.s32 1, %s1814_s20   ;;  %s2481_s15 = smov %s1798_s16 }
 0x251   : > { %p18_p3 = scmp.ge.s32.totalorder %s21_s20, 4   ;;  %s2482_s16 = smov %s1802_s17 }
 0x252   : > { %s2483_s17 = smov %s1913_s28  ;;  %s2484_s18 = smov %s1810_s19 }
 0x253   : > { %s2485_s19 = smov %s2487_s23  ;;  %20 = sbr.rel (!%p18_p3) target bundleno = 6 (0x6), region = 94 }
 0x258   :  { %1403 = vsyncpa [#allocation3], 1 }
 0x259   :  { %1405 = vsyncpa [#allocation3 + $0x1], 1 }
 0x25a   :  { %1406 = vsyncpa [#allocation5], 1 }
 0x25b   :  { %1408 = vsyncpa [#allocation5 + $0x1], 1 }

</bundles_post_ra>
